<compile_context>
chip_gen: v7x
topology: tpu7x:2x2x1
jax: 0.10.0
libtpu: 0.0.40
codegen_flags: <defaults>
</compile_context>

<pallas_src>
import math

import jax
import jax.numpy as jnp
import numpy as np
from jax.experimental import pallas as pl
from jax.experimental.pallas import tpu as pltpu

INV_SQRT_2 = 1.0 / math.sqrt(2.0)
_SILU_SCALE = 1.0 / 0.6          # ScaledSiLU used by gemnet's Dense(activation="silu")
MXU_DTYPE = jnp.bfloat16         # operands of the large structure-factor matmuls (f32 accumulate)

_HAS_BUFFERED = hasattr(pl, "Buffered")
_SQUEEZED = pl.Squeezed() if hasattr(pl, "Squeezed") else None


def _act(x):
    return jax.nn.silu(x) * _SILU_SCALE


def _round_up(x, m):
    return (x + m - 1) // m * m


def _ewald_kernel(h_ref, trig_ref, trig_t_ref, kf2_ref,
                  wp1_ref, wp2_ref, wd_ref, wra_ref, wrb_ref,
                  out_ref):
    """One grid step == one batch (graph). All row blocks belong to that batch only; steps are
    fully independent and write disjoint output rows (grid axis is 'parallel')."""
    h = h_ref[...]                                                          # (M, E) f32
    # pre_residual: ResidualLayer(emb, nLayers=2): (h + act(act(h@W1)@W2)) / sqrt(2)
    t = _act(jnp.dot(h, wp1_ref[...], preferred_element_type=jnp.float32))
    t = _act(jnp.dot(t, wp2_ref[...], preferred_element_type=jnp.float32))
    hres = ((h + t) * INV_SQRT_2).astype(MXU_DTYPE)                         # (M, E) bf16

    # Structure factors for this batch (torch index_add_): sf = [cos;sin]^T @ hres.
    sf = jnp.dot(trig_t_ref[...], hres, preferred_element_type=jnp.float32)  # (2K, E) f32
    sf_k = (sf * kf2_ref[...]).astype(MXU_DTYPE)                             # kfilter applied

    # Per-atom gather-back + sum over k (torch index_select + sum(dim=1)), real/imag fused.
    contrib = jnp.dot(trig_ref[...], sf_k, preferred_element_type=jnp.float32)  # (M, E) f32

    hu = 0.01 * contrib
    # ewald_layers: Dense(act, bias=False) followed by one ResidualLayer (num_hidden=1)
    hu = _act(jnp.dot(hu, wd_ref[...], preferred_element_type=jnp.float32))
    t2 = _act(jnp.dot(hu, wra_ref[...], preferred_element_type=jnp.float32))
    t2 = _act(jnp.dot(t2, wrb_ref[...], preferred_element_type=jnp.float32))
    out_ref[...] = ((hu + t2) * INV_SQRT_2).astype(out_ref.dtype)


def _vmem_cap_bytes():
    try:
        return int(0.85 * pltpu.get_tpu_info().vmem_capacity_bytes)
    except Exception:
        return 56 << 20   # conservative: fits v7x's 64 MiB physical VMEM per TensorCore


def ewald_block_forward(h, x, k, num_batch, batch_seg, dot, params):
    """Returns (h_update, dot, sinc_damping), matching EwaldBlock.forward (return_k_params=True)."""
    N, E = h.shape
    K = dot.shape[-1]
    B = int(num_batch)
    f32 = jnp.float32

    E_pad = _round_up(E, 128)
    K_pad = _round_up(K, 128)

    # ---- grouped-segment layout (host-side; batch_seg is concrete here; precompute under jit) ----
    seg_np = np.asarray(batch_seg).astype(np.int64)
    counts = np.bincount(seg_np, minlength=B)
    M = int(_round_up(max(int(counts.max()), 1), 8))     # padded atoms-per-batch tile
    starts = np.concatenate([np.zeros(1, np.int64), np.cumsum(counts)[:-1]])
    order = np.argsort(seg_np, kind="stable")
    rank_sorted = np.arange(N, dtype=np.int64) - starts[seg_np[order]]
    rows_np = np.empty(N, dtype=np.int64)
    rows_np[order] = seg_np[order] * M + rank_sorted
    rows = jnp.asarray(rows_np, dtype=jnp.int32)

    # Scatter atoms into the grouped, lane-padded layout; ghost rows stay exactly zero.
    h_g = jnp.zeros((B * M, E_pad), f32).at[rows, :E].set(h.astype(f32)).reshape(B, M, E_pad)
    dot_g = jnp.zeros((B * M, K_pad), f32).at[rows, :K].set(dot.astype(f32)).reshape(B, M, K_pad)

    # Trig precompute moved to the wrapper (each block read once; bf16 halves DMA/VMEM).
    trig_g = jnp.concatenate([jnp.cos(dot_g), jnp.sin(dot_g)], axis=-1).astype(MXU_DTYPE)  # (B,M,2K)
    trig_t_g = jnp.transpose(trig_g, (0, 2, 1))                                            # (B,2K,M)

    # use_pbc=True: kfilter = matmul(up.weight [E,D], down.weight [D,K]).T -> [K, E]
    # Zero padding of its K/E extents is the invariant that cancels cos(0)=1 ghost-k entries.
    kfilter = jnp.matmul(params["up_w"], params["down_w"]).T
    kf_pad = jnp.zeros((K_pad, E_pad), f32).at[:K, :E].set(kfilter.astype(f32))
    kf2 = jnp.concatenate([kf_pad, kf_pad], axis=0)                                        # (2K_pad, E_pad)

    def pad_w(w):
        return jnp.zeros((E_pad, E_pad), f32).at[:E, :E].set(w.astype(f32))

    wp1, wp2, wd, wra, wrb = (pad_w(params[n]) for n in ("wp1", "wp2", "wd", "wra", "wrb"))

    # ---- specs -----------------------------------------------------------------------------------
    def build_in_specs(single_buffer):
        def inv(shape):
            if single_buffer:
                return pl.BlockSpec(shape, lambda b: (0, 0), pipeline_mode=pl.Buffered(1))
            return pl.BlockSpec(shape, lambda b: (0, 0))

        def per_batch(r, c):
            return pl.BlockSpec((_SQUEEZED, r, c), lambda b: (b, 0, 0))

        return ([per_batch(M, E_pad),           # h   (this batch's rows)
                 per_batch(M, 2 * K_pad),       # [cos | sin]
                 per_batch(2 * K_pad, M),       # [cos ; sin]^T
                 inv((2 * K_pad, E_pad))]       # stacked kfilter (grid-invariant)
                + [inv((E_pad, E_pad))] * 5)    # wp1, wp2, wd, wra, wrb (grid-invariant)

    out_spec = pl.BlockSpec((_SQUEEZED, M, E_pad), lambda b: (b, 0, 0))

    # ---- VMEM budget (varying blocks double-buffered, invariant blocks single-buffered) -----------
    def buf_bytes(shape, dtype, nbuf):
        r = _round_up(shape[-2], 8)
        c = _round_up(shape[-1], 128)
        return r * c * np.dtype(dtype).itemsize * nbuf

    nb_inv = 1 if _HAS_BUFFERED else 2
    est = (buf_bytes((M, E_pad), f32, 2)
           + buf_bytes((M, 2 * K_pad), MXU_DTYPE, 2)
           + buf_bytes((2 * K_pad, M), MXU_DTYPE, 2)
           + buf_bytes((2 * K_pad, E_pad), f32, nb_inv)
           + 5 * buf_bytes((E_pad, E_pad), f32, nb_inv)
           + buf_bytes((M, E_pad), f32, 2))
    vmem_limit = int(min(max(int(1.5 * est) + (8 << 20), 24 << 20), _vmem_cap_bytes()))

    # Advisory cost estimate so XLA schedules the wrapper-side work around the kernel.
    flops = 2 * B * M * (2 * K_pad) * E_pad * 2 + 2 * B * M * E_pad * E_pad * 5
    bytes_accessed = int(h_g.size * 4 + trig_g.size * 2 + trig_t_g.size * 2
                         + kf2.size * 4 + 5 * E_pad * E_pad * 4 + B * M * E_pad * 4)
    cost = pl.CostEstimate(flops=int(flops),
                           transcendentals=int(5 * B * M * E_pad),
                           bytes_accessed=bytes_accessed)

    def run(single_buffer):
        return pl.pallas_call(
            _ewald_kernel,
            out_shape=jax.ShapeDtypeStruct((B, M, E_pad), jnp.float32),
            grid=(B,),
            in_specs=build_in_specs(single_buffer),
            out_specs=out_spec,
            compiler_params=pltpu.CompilerParams(
                dimension_semantics=("parallel",),       # disjoint output rows per step
                vmem_limit_bytes=vmem_limit),
            cost_estimate=cost,
        )(h_g, trig_g, trig_t_g, kf2, wp1, wp2, wd, wra, wrb)

    if _HAS_BUFFERED:
        try:
            out_g = run(True)
        except Exception:
            out_g = run(False)   # fallback: default double-buffering of invariant inputs
    else:
        out_g = run(False)

    h_update = out_g.reshape(B * M, E_pad)[rows, :E]
    sinc_damping = jnp.float32(1.0)   # use_pbc == True branch
    return h_update, dot, sinc_damping


def ewald_block_reference(h, num_batch, batch_seg, dot, params):
    """Pure-JAX reference mirroring the PyTorch forward (use_pbc=True, sinc_damping=1)."""
    kfilter = jnp.matmul(params["up_w"], params["down_w"]).T
    hres = (h + _act(_act(h @ params["wp1"]) @ params["wp2"])) * INV_SQRT_2
    cosd, sind = jnp.cos(dot), jnp.sin(dot)
    seg = jax.nn.one_hot(batch_seg, num_batch, dtype=h.dtype)           # [N, B]
    sf_real = jnp.einsum("nb,nk,ne->bke", seg, cosd, hres)              # index_add_
    sf_imag = jnp.einsum("nb,nk,ne->bke", seg, sind, hres)
    sfr = sf_real[batch_seg] * kfilter[None]                            # index_select * kfilter
    sfi = sf_imag[batch_seg] * kfilter[None]
    hu = 0.01 * (jnp.einsum("nke,nk->ne", sfr, cosd) + jnp.einsum("nke,nk->ne", sfi, sind))
    hu = _act(hu @ params["wd"])
    t = _act(_act(hu @ params["wra"]) @ params["wrb"])
    return (hu + t) * INV_SQRT_2


if __name__ == "__main__":
    # Small shapes: N atoms, emb_size_atom E, num_k K, downprojection_size D, num_batch B.
    N, E, K, D, B = 8, 32, 16, 8, 2
    key = jax.random.PRNGKey(0)
    ks = jax.random.split(key, 10)

    h = jax.random.normal(ks[0], (N, E), jnp.float32)
    x = jax.random.normal(ks[1], (N, 3), jnp.float32)
    kvec = jax.random.normal(ks[2], (B, K, 3), jnp.float32)
    batch_seg = jnp.array([0, 0, 0, 0, 1, 1, 1, 1], jnp.int32)
    # dot provided non-empty (k . x per atom per k-point), as built by the caller
    dot = jnp.einsum("nd,nkd->nk", x, kvec[batch_seg])

    params = dict(
        down_w=jax.random.normal(ks[3], (D, K), jnp.float32) / math.sqrt(K),   # shared_downprojection
        up_w=jax.random.normal(ks[4], (E, D), jnp.float32) / math.sqrt(D),     # self.up
        wp1=jax.random.normal(ks[5], (E, E), jnp.float32) / math.sqrt(E),      # pre_residual dense 1
        wp2=jax.random.normal(ks[6], (E, E), jnp.float32) / math.sqrt(E),      # pre_residual dense 2
        wd=jax.random.normal(ks[7], (E, E), jnp.float32) / math.sqrt(E),       # ewald_layers dense1
        wra=jax.random.normal(ks[8], (E, E), jnp.float32) / math.sqrt(E),      # residual dense a
        wrb=jax.random.normal(ks[9], (E, E), jnp.float32) / math.sqrt(E),      # residual dense b
    )

    h_update, dot_out, sinc = ewald_block_forward(h, x, kvec, B, batch_seg, dot, params)
    jax.block_until_ready(h_update)

    ref = ewald_block_reference(h, B, batch_seg, dot, params)
    # bf16 MXU operands on the structure-factor matmuls -> loosened tolerance (f32 accumulation).
    np.testing.assert_allclose(np.asarray(h_update), np.asarray(ref), rtol=3e-2, atol=2e-3)
    print("KERNEL_OK")
</pallas_src>

<mosaic_0001>
module attributes {stable_mosaic.version = 11 : i64} {
  func.func @_ewald_kernel(%arg0: i32, %arg1: memref<1x8x128xf32, #tpu.memory_space<vmem>>, %arg2: memref<1x8x256xbf16, #tpu.memory_space<vmem>>, %arg3: memref<1x256x8xbf16, #tpu.memory_space<vmem>>, %arg4: memref<256x128xf32, #tpu.memory_space<vmem>>, %arg5: memref<128x128xf32, #tpu.memory_space<vmem>>, %arg6: memref<128x128xf32, #tpu.memory_space<vmem>>, %arg7: memref<128x128xf32, #tpu.memory_space<vmem>>, %arg8: memref<128x128xf32, #tpu.memory_space<vmem>>, %arg9: memref<128x128xf32, #tpu.memory_space<vmem>>, %arg10: memref<1x8x128xf32, #tpu.memory_space<vmem>>) attributes {dimension_semantics = [#tpu.dimension_semantics<parallel>], iteration_bounds = array<i64: 2>, scalar_prefetch = 0 : i64, scratch_operands = 0 : i64, tpu.core_type = #tpu.core_type<tc>, window_params = [{transform_indices = @transform_0, window_bounds = array<i64: 1, 8, 128>}, {transform_indices = @transform_1, window_bounds = array<i64: 1, 8, 256>}, {transform_indices = @transform_2, window_bounds = array<i64: 1, 256, 8>}, {pipeline_mode = #tpu.pipeline_mode<synchronous>, transform_indices = @transform_3, window_bounds = array<i64: 256, 128>}, {pipeline_mode = #tpu.pipeline_mode<synchronous>, transform_indices = @transform_4, window_bounds = array<i64: 128, 128>}, {pipeline_mode = #tpu.pipeline_mode<synchronous>, transform_indices = @transform_5, window_bounds = array<i64: 128, 128>}, {pipeline_mode = #tpu.pipeline_mode<synchronous>, transform_indices = @transform_6, window_bounds = array<i64: 128, 128>}, {pipeline_mode = #tpu.pipeline_mode<synchronous>, transform_indices = @transform_7, window_bounds = array<i64: 128, 128>}, {pipeline_mode = #tpu.pipeline_mode<synchronous>, transform_indices = @transform_8, window_bounds = array<i64: 128, 128>}, {transform_indices = @transform_9, window_bounds = array<i64: 1, 8, 128>}]} {
    %c0 = arith.constant 0 : index
    %c0_0 = arith.constant 0 : index
    %c0_1 = arith.constant 0 : index
    %0 = vector.load %arg1[%c0, %c0_0, %c0_1] : memref<1x8x128xf32, #tpu.memory_space<vmem>>, vector<1x8x128xf32>
    %1 = vector.shape_cast %0 : vector<1x8x128xf32> to vector<8x128xf32>
    %c0_2 = arith.constant 0 : index
    %c0_3 = arith.constant 0 : index
    %2 = vector.load %arg5[%c0_2, %c0_3] : memref<128x128xf32, #tpu.memory_space<vmem>>, vector<128x128xf32>
    %cst = arith.constant dense<0.000000e+00> : vector<8x128xf32>
    %3 = tpu.matmul %1, %2, %cst {dimension_numbers = #tpu.dot_dimension_numbers<[1], [0], [0], [1], [0, 0, 1, 1], [], []>} : vector<8x128xf32>, vector<128x128xf32>, vector<8x128xf32> -> vector<8x128xf32>
    %4 = arith.negf %3 : vector<8x128xf32>
    %5 = math.exp %4 : vector<8x128xf32>
    %cst_4 = arith.constant 1.000000e+00 : f32
    %6 = vector.broadcast %cst_4 : f32 to vector<8x128xf32>
    %7 = arith.addf %6, %5 : vector<8x128xf32>
    %8 = arith.divf %6, %7 : vector<8x128xf32>
    %9 = arith.mulf %3, %8 : vector<8x128xf32>
    %cst_5 = arith.constant 1.66666663 : f32
    %10 = vector.broadcast %cst_5 : f32 to vector<8x128xf32>
    %11 = arith.mulf %9, %10 : vector<8x128xf32>
    %c0_6 = arith.constant 0 : index
    %c0_7 = arith.constant 0 : index
    %12 = vector.load %arg6[%c0_6, %c0_7] : memref<128x128xf32, #tpu.memory_space<vmem>>, vector<128x128xf32>
    %cst_8 = arith.constant dense<0.000000e+00> : vector<8x128xf32>
    %13 = tpu.matmul %11, %12, %cst_8 {dimension_numbers = #tpu.dot_dimension_numbers<[1], [0], [0], [1], [0, 0, 1, 1], [], []>} : vector<8x128xf32>, vector<128x128xf32>, vector<8x128xf32> -> vector<8x128xf32>
    %14 = arith.negf %13 : vector<8x128xf32>
    %15 = math.exp %14 : vector<8x128xf32>
    %cst_9 = arith.constant 1.000000e+00 : f32
    %16 = vector.broadcast %cst_9 : f32 to vector<8x128xf32>
    %17 = arith.addf %16, %15 : vector<8x128xf32>
    %18 = arith.divf %16, %17 : vector<8x128xf32>
    %19 = arith.mulf %13, %18 : vector<8x128xf32>
    %cst_10 = arith.constant 1.66666663 : f32
    %20 = vector.broadcast %cst_10 : f32 to vector<8x128xf32>
    %21 = arith.mulf %19, %20 : vector<8x128xf32>
    %22 = arith.addf %1, %21 : vector<8x128xf32>
    %cst_11 = arith.constant 0.707106769 : f32
    %23 = vector.broadcast %cst_11 : f32 to vector<8x128xf32>
    %24 = arith.mulf %22, %23 : vector<8x128xf32>
    %25 = arith.truncf %24 : vector<8x128xf32> to vector<8x128xbf16>
    %c0_12 = arith.constant 0 : index
    %c0_13 = arith.constant 0 : index
    %c0_14 = arith.constant 0 : index
    %26 = vector.load %arg3[%c0_12, %c0_13, %c0_14] : memref<1x256x8xbf16, #tpu.memory_space<vmem>>, vector<1x256x8xbf16>
    %27 = vector.shape_cast %26 : vector<1x256x8xbf16> to vector<256x8xbf16>
    %cst_15 = arith.constant dense<0.000000e+00> : vector<256x128xf32>
    %28 = tpu.matmul %27, %25, %cst_15 {dimension_numbers = #tpu.dot_dimension_numbers<[1], [0], [0], [1], [0, 0, 1, 1], [], []>} : vector<256x8xbf16>, vector<8x128xbf16>, vector<256x128xf32> -> vector<256x128xf32>
    %c0_16 = arith.constant 0 : index
    %c0_17 = arith.constant 0 : index
    %29 = vector.load %arg4[%c0_16, %c0_17] : memref<256x128xf32, #tpu.memory_space<vmem>>, vector<256x128xf32>
    %30 = arith.mulf %28, %29 : vector<256x128xf32>
    %31 = arith.truncf %30 : vector<256x128xf32> to vector<256x128xbf16>
    %c0_18 = arith.constant 0 : index
    %c0_19 = arith.constant 0 : index
    %c0_20 = arith.constant 0 : index
    %32 = vector.load %arg2[%c0_18, %c0_19, %c0_20] : memref<1x8x256xbf16, #tpu.memory_space<vmem>>, vector<1x8x256xbf16>
    %33 = vector.shape_cast %32 : vector<1x8x256xbf16> to vector<8x256xbf16>
    %cst_21 = arith.constant dense<0.000000e+00> : vector<8x128xf32>
    %34 = tpu.matmul %33, %31, %cst_21 {dimension_numbers = #tpu.dot_dimension_numbers<[1], [0], [0], [1], [0, 0, 1, 1], [], []>} : vector<8x256xbf16>, vector<256x128xbf16>, vector<8x128xf32> -> vector<8x128xf32>
    %cst_22 = arith.constant 0.00999999977 : f32
    %35 = vector.broadcast %cst_22 : f32 to vector<8x128xf32>
    %36 = arith.mulf %35, %34 : vector<8x128xf32>
    %c0_23 = arith.constant 0 : index
    %c0_24 = arith.constant 0 : index
    %37 = vector.load %arg7[%c0_23, %c0_24] : memref<128x128xf32, #tpu.memory_space<vmem>>, vector<128x128xf32>
    %cst_25 = arith.constant dense<0.000000e+00> : vector<8x128xf32>
    %38 = tpu.matmul %36, %37, %cst_25 {dimension_numbers = #tpu.dot_dimension_numbers<[1], [0], [0], [1], [0, 0, 1, 1], [], []>} : vector<8x128xf32>, vector<128x128xf32>, vector<8x128xf32> -> vector<8x128xf32>
    %39 = arith.negf %38 : vector<8x128xf32>
    %40 = math.exp %39 : vector<8x128xf32>
    %cst_26 = arith.constant 1.000000e+00 : f32
    %41 = vector.broadcast %cst_26 : f32 to vector<8x128xf32>
    %42 = arith.addf %41, %40 : vector<8x128xf32>
    %43 = arith.divf %41, %42 : vector<8x128xf32>
    %44 = arith.mulf %38, %43 : vector<8x128xf32>
    %cst_27 = arith.constant 1.66666663 : f32
    %45 = vector.broadcast %cst_27 : f32 to vector<8x128xf32>
    %46 = arith.mulf %44, %45 : vector<8x128xf32>
    %c0_28 = arith.constant 0 : index
    %c0_29 = arith.constant 0 : index
    %47 = vector.load %arg8[%c0_28, %c0_29] : memref<128x128xf32, #tpu.memory_space<vmem>>, vector<128x128xf32>
    %cst_30 = arith.constant dense<0.000000e+00> : vector<8x128xf32>
    %48 = tpu.matmul %46, %47, %cst_30 {dimension_numbers = #tpu.dot_dimension_numbers<[1], [0], [0], [1], [0, 0, 1, 1], [], []>} : vector<8x128xf32>, vector<128x128xf32>, vector<8x128xf32> -> vector<8x128xf32>
    %49 = arith.negf %48 : vector<8x128xf32>
    %50 = math.exp %49 : vector<8x128xf32>
    %cst_31 = arith.constant 1.000000e+00 : f32
    %51 = vector.broadcast %cst_31 : f32 to vector<8x128xf32>
    %52 = arith.addf %51, %50 : vector<8x128xf32>
    %53 = arith.divf %51, %52 : vector<8x128xf32>
    %54 = arith.mulf %48, %53 : vector<8x128xf32>
    %cst_32 = arith.constant 1.66666663 : f32
    %55 = vector.broadcast %cst_32 : f32 to vector<8x128xf32>
    %56 = arith.mulf %54, %55 : vector<8x128xf32>
    %c0_33 = arith.constant 0 : index
    %c0_34 = arith.constant 0 : index
    %57 = vector.load %arg9[%c0_33, %c0_34] : memref<128x128xf32, #tpu.memory_space<vmem>>, vector<128x128xf32>
    %cst_35 = arith.constant dense<0.000000e+00> : vector<8x128xf32>
    %58 = tpu.matmul %56, %57, %cst_35 {dimension_numbers = #tpu.dot_dimension_numbers<[1], [0], [0], [1], [0, 0, 1, 1], [], []>} : vector<8x128xf32>, vector<128x128xf32>, vector<8x128xf32> -> vector<8x128xf32>
    %59 = arith.negf %58 : vector<8x128xf32>
    %60 = math.exp %59 : vector<8x128xf32>
    %cst_36 = arith.constant 1.000000e+00 : f32
    %61 = vector.broadcast %cst_36 : f32 to vector<8x128xf32>
    %62 = arith.addf %61, %60 : vector<8x128xf32>
    %63 = arith.divf %61, %62 : vector<8x128xf32>
    %64 = arith.mulf %58, %63 : vector<8x128xf32>
    %cst_37 = arith.constant 1.66666663 : f32
    %65 = vector.broadcast %cst_37 : f32 to vector<8x128xf32>
    %66 = arith.mulf %64, %65 : vector<8x128xf32>
    %67 = arith.addf %46, %66 : vector<8x128xf32>
    %cst_38 = arith.constant 0.707106769 : f32
    %68 = vector.broadcast %cst_38 : f32 to vector<8x128xf32>
    %69 = arith.mulf %67, %68 : vector<8x128xf32>
    %c0_39 = arith.constant 0 : index
    %c0_40 = arith.constant 0 : index
    %c0_41 = arith.constant 0 : index
    %70 = vector.load %arg10[%c0_39, %c0_40, %c0_41] : memref<1x8x128xf32, #tpu.memory_space<vmem>>, vector<1x8x128xf32>
    %71 = vector.shape_cast %70 : vector<1x8x128xf32> to vector<8x128xf32>
    %72 = vector.shape_cast %69 : vector<8x128xf32> to vector<1x8x128xf32>
    tpu.vector_store %arg10[%c0_39, %c0_40, %c0_41], %72 {strides = array<i32>} : memref<1x8x128xf32, #tpu.memory_space<vmem>>, vector<1x8x128xf32>,
    return
  }
  func.func @transform_0(%arg0: i32) -> (i32, i32, i32) {
    %c0_i32 = arith.constant 0 : i32
    %c0_i32_0 = arith.constant 0 : i32
    %c0_i32_1 = arith.constant 0 : i32
    return %arg0, %c0_i32, %c0_i32_0 : i32, i32, i32
  }
  func.func @transform_1(%arg0: i32) -> (i32, i32, i32) {
    %c0_i32 = arith.constant 0 : i32
    %c0_i32_0 = arith.constant 0 : i32
    %c0_i32_1 = arith.constant 0 : i32
    return %arg0, %c0_i32, %c0_i32_0 : i32, i32, i32
  }
  func.func @transform_2(%arg0: i32) -> (i32, i32, i32) {
    %c0_i32 = arith.constant 0 : i32
    %c0_i32_0 = arith.constant 0 : i32
    %c0_i32_1 = arith.constant 0 : i32
    return %arg0, %c0_i32, %c0_i32_0 : i32, i32, i32
  }
  func.func @transform_3(%arg0: i32) -> (i32, i32) {
    %c0_i32 = arith.constant 0 : i32
    %c0_i32_0 = arith.constant 0 : i32
    %c0_i32_1 = arith.constant 0 : i32
    return %c0_i32, %c0_i32_0 : i32, i32
  }
  func.func @transform_4(%arg0: i32) -> (i32, i32) {
    %c0_i32 = arith.constant 0 : i32
    %c0_i32_0 = arith.constant 0 : i32
    %c0_i32_1 = arith.constant 0 : i32
    return %c0_i32, %c0_i32_0 : i32, i32
  }
  func.func @transform_5(%arg0: i32) -> (i32, i32) {
    %c0_i32 = arith.constant 0 : i32
    %c0_i32_0 = arith.constant 0 : i32
    %c0_i32_1 = arith.constant 0 : i32
    return %c0_i32, %c0_i32_0 : i32, i32
  }
  func.func @transform_6(%arg0: i32) -> (i32, i32) {
    %c0_i32 = arith.constant 0 : i32
    %c0_i32_0 = arith.constant 0 : i32
    %c0_i32_1 = arith.constant 0 : i32
    return %c0_i32, %c0_i32_0 : i32, i32
  }
  func.func @transform_7(%arg0: i32) -> (i32, i32) {
    %c0_i32 = arith.constant 0 : i32
    %c0_i32_0 = arith.constant 0 : i32
    %c0_i32_1 = arith.constant 0 : i32
    return %c0_i32, %c0_i32_0 : i32, i32
  }
  func.func @transform_8(%arg0: i32) -> (i32, i32) {
    %c0_i32 = arith.constant 0 : i32
    %c0_i32_0 = arith.constant 0 : i32
    %c0_i32_1 = arith.constant 0 : i32
    return %c0_i32, %c0_i32_0 : i32, i32
  }
  func.func @transform_9(%arg0: i32) -> (i32, i32, i32) {
    %c0_i32 = arith.constant 0 : i32
    %c0_i32_0 = arith.constant 0 : i32
    %c0_i32_1 = arith.constant 0 : i32
    return %arg0, %c0_i32, %c0_i32_0 : i32, i32, i32
  }
}

module attributes {stable_mosaic.version = 11 : i64} {
  func.func @_ewald_kernel(%arg0: i32, %arg1: memref<1x8x128xf32, #tpu.memory_space<vmem>>, %arg2: memref<1x8x256xbf16, #tpu.memory_space<vmem>>, %arg3: memref<1x256x8xbf16, #tpu.memory_space<vmem>>, %arg4: memref<256x128xf32, #tpu.memory_space<vmem>>, %arg5: memref<128x128xf32, #tpu.memory_space<vmem>>, %arg6: memref<128x128xf32, #tpu.memory_space<vmem>>, %arg7: memref<128x128xf32, #tpu.memory_space<vmem>>, %arg8: memref<128x128xf32, #tpu.memory_space<vmem>>, %arg9: memref<128x128xf32, #tpu.memory_space<vmem>>, %arg10: memref<1x8x128xf32, #tpu.memory_space<vmem>>) attributes {dimension_semantics = [#tpu.dimension_semantics<parallel>], iteration_bounds = array<i64: 2>, scalar_prefetch = 0 : i64, scratch_operands = 0 : i64, tpu.core_type = #tpu.core_type<tc>, window_params = [{transform_indices = @transform_0, window_bounds = array<i64: 1, 8, 128>}, {transform_indices = @transform_1, window_bounds = array<i64: 1, 8, 256>}, {transform_indices = @transform_2, window_bounds = array<i64: 1, 256, 8>}, {pipeline_mode = #tpu.pipeline_mode<synchronous>, transform_indices = @transform_3, window_bounds = array<i64: 256, 128>}, {pipeline_mode = #tpu.pipeline_mode<synchronous>, transform_indices = @transform_4, window_bounds = array<i64: 128, 128>}, {pipeline_mode = #tpu.pipeline_mode<synchronous>, transform_indices = @transform_5, window_bounds = array<i64: 128, 128>}, {pipeline_mode = #tpu.pipeline_mode<synchronous>, transform_indices = @transform_6, window_bounds = array<i64: 128, 128>}, {pipeline_mode = #tpu.pipeline_mode<synchronous>, transform_indices = @transform_7, window_bounds = array<i64: 128, 128>}, {pipeline_mode = #tpu.pipeline_mode<synchronous>, transform_indices = @transform_8, window_bounds = array<i64: 128, 128>}, {transform_indices = @transform_9, window_bounds = array<i64: 1, 8, 128>}]} {
    %c0 = arith.constant 0 : index
    %c0_0 = arith.constant 0 : index
    %c0_1 = arith.constant 0 : index
    %0 = vector.load %arg1[%c0, %c0_0, %c0_1] : memref<1x8x128xf32, #tpu.memory_space<vmem>>, vector<1x8x128xf32>
    %1 = vector.shape_cast %0 : vector<1x8x128xf32> to vector<8x128xf32>
    %c0_2 = arith.constant 0 : index
    %c0_3 = arith.constant 0 : index
    %2 = vector.load %arg5[%c0_2, %c0_3] : memref<128x128xf32, #tpu.memory_space<vmem>>, vector<128x128xf32>
    %cst = arith.constant dense<0.000000e+00> : vector<8x128xf32>
    %3 = tpu.matmul %1, %2, %cst {dimension_numbers = #tpu.dot_dimension_numbers<[1], [0], [0], [1], [0, 0, 1, 1], [], []>} : vector<8x128xf32>, vector<128x128xf32>, vector<8x128xf32> -> vector<8x128xf32>
    %4 = arith.negf %3 : vector<8x128xf32>
    %5 = math.exp %4 : vector<8x128xf32>
    %cst_4 = arith.constant 1.000000e+00 : f32
    %6 = vector.broadcast %cst_4 : f32 to vector<8x128xf32>
    %7 = arith.addf %6, %5 : vector<8x128xf32>
    %8 = arith.divf %6, %7 : vector<8x128xf32>
    %9 = arith.mulf %3, %8 : vector<8x128xf32>
    %cst_5 = arith.constant 1.66666663 : f32
    %10 = vector.broadcast %cst_5 : f32 to vector<8x128xf32>
    %11 = arith.mulf %9, %10 : vector<8x128xf32>
    %c0_6 = arith.constant 0 : index
    %c0_7 = arith.constant 0 : index
    %12 = vector.load %arg6[%c0_6, %c0_7] : memref<128x128xf32, #tpu.memory_space<vmem>>, vector<128x128xf32>
    %cst_8 = arith.constant dense<0.000000e+00> : vector<8x128xf32>
    %13 = tpu.matmul %11, %12, %cst_8 {dimension_numbers = #tpu.dot_dimension_numbers<[1], [0], [0], [1], [0, 0, 1, 1], [], []>} : vector<8x128xf32>, vector<128x128xf32>, vector<8x128xf32> -> vector<8x128xf32>
    %14 = arith.negf %13 : vector<8x128xf32>
    %15 = math.exp %14 : vector<8x128xf32>
    %cst_9 = arith.constant 1.000000e+00 : f32
    %16 = vector.broadcast %cst_9 : f32 to vector<8x128xf32>
    %17 = arith.addf %16, %15 : vector<8x128xf32>
    %18 = arith.divf %16, %17 : vector<8x128xf32>
    %19 = arith.mulf %13, %18 : vector<8x128xf32>
    %cst_10 = arith.constant 1.66666663 : f32
    %20 = vector.broadcast %cst_10 : f32 to vector<8x128xf32>
    %21 = arith.mulf %19, %20 : vector<8x128xf32>
    %22 = arith.addf %1, %21 : vector<8x128xf32>
    %cst_11 = arith.constant 0.707106769 : f32
    %23 = vector.broadcast %cst_11 : f32 to vector<8x128xf32>
    %24 = arith.mulf %22, %23 : vector<8x128xf32>
    %25 = arith.truncf %24 : vector<8x128xf32> to vector<8x128xbf16>
    %c0_12 = arith.constant 0 : index
    %c0_13 = arith.constant 0 : index
    %c0_14 = arith.constant 0 : index
    %26 = vector.load %arg3[%c0_12, %c0_13, %c0_14] : memref<1x256x8xbf16, #tpu.memory_space<vmem>>, vector<1x256x8xbf16>
    %27 = vector.shape_cast %26 : vector<1x256x8xbf16> to vector<256x8xbf16>
    %cst_15 = arith.constant dense<0.000000e+00> : vector<256x128xf32>
    %28 = tpu.matmul %27, %25, %cst_15 {dimension_numbers = #tpu.dot_dimension_numbers<[1], [0], [0], [1], [0, 0, 1, 1], [], []>} : vector<256x8xbf16>, vector<8x128xbf16>, vector<256x128xf32> -> vector<256x128xf32>
    %c0_16 = arith.constant 0 : index
    %c0_17 = arith.constant 0 : index
    %29 = vector.load %arg4[%c0_16, %c0_17] : memref<256x128xf32, #tpu.memory_space<vmem>>, vector<256x128xf32>
    %30 = arith.mulf %28, %29 : vector<256x128xf32>
    %31 = arith.truncf %30 : vector<256x128xf32> to vector<256x128xbf16>
    %c0_18 = arith.constant 0 : index
    %c0_19 = arith.constant 0 : index
    %c0_20 = arith.constant 0 : index
    %32 = vector.load %arg2[%c0_18, %c0_19, %c0_20] : memref<1x8x256xbf16, #tpu.memory_space<vmem>>, vector<1x8x256xbf16>
    %33 = vector.shape_cast %32 : vector<1x8x256xbf16> to vector<8x256xbf16>
    %cst_21 = arith.constant dense<0.000000e+00> : vector<8x128xf32>
    %34 = tpu.matmul %33, %31, %cst_21 {dimension_numbers = #tpu.dot_dimension_numbers<[1], [0], [0], [1], [0, 0, 1, 1], [], []>} : vector<8x256xbf16>, vector<256x128xbf16>, vector<8x128xf32> -> vector<8x128xf32>
    %cst_22 = arith.constant 0.00999999977 : f32
    %35 = vector.broadcast %cst_22 : f32 to vector<8x128xf32>
    %36 = arith.mulf %35, %34 : vector<8x128xf32>
    %c0_23 = arith.constant 0 : index
    %c0_24 = arith.constant 0 : index
    %37 = vector.load %arg7[%c0_23, %c0_24] : memref<128x128xf32, #tpu.memory_space<vmem>>, vector<128x128xf32>
    %cst_25 = arith.constant dense<0.000000e+00> : vector<8x128xf32>
    %38 = tpu.matmul %36, %37, %cst_25 {dimension_numbers = #tpu.dot_dimension_numbers<[1], [0], [0], [1], [0, 0, 1, 1], [], []>} : vector<8x128xf32>, vector<128x128xf32>, vector<8x128xf32> -> vector<8x128xf32>
    %39 = arith.negf %38 : vector<8x128xf32>
    %40 = math.exp %39 : vector<8x128xf32>
    %cst_26 = arith.constant 1.000000e+00 : f32
    %41 = vector.broadcast %cst_26 : f32 to vector<8x128xf32>
    %42 = arith.addf %41, %40 : vector<8x128xf32>
    %43 = arith.divf %41, %42 : vector<8x128xf32>
    %44 = arith.mulf %38, %43 : vector<8x128xf32>
    %cst_27 = arith.constant 1.66666663 : f32
    %45 = vector.broadcast %cst_27 : f32 to vector<8x128xf32>
    %46 = arith.mulf %44, %45 : vector<8x128xf32>
    %c0_28 = arith.constant 0 : index
    %c0_29 = arith.constant 0 : index
    %47 = vector.load %arg8[%c0_28, %c0_29] : memref<128x128xf32, #tpu.memory_space<vmem>>, vector<128x128xf32>
    %cst_30 = arith.constant dense<0.000000e+00> : vector<8x128xf32>
    %48 = tpu.matmul %46, %47, %cst_30 {dimension_numbers = #tpu.dot_dimension_numbers<[1], [0], [0], [1], [0, 0, 1, 1], [], []>} : vector<8x128xf32>, vector<128x128xf32>, vector<8x128xf32> -> vector<8x128xf32>
    %49 = arith.negf %48 : vector<8x128xf32>
    %50 = math.exp %49 : vector<8x128xf32>
    %cst_31 = arith.constant 1.000000e+00 : f32
    %51 = vector.broadcast %cst_31 : f32 to vector<8x128xf32>
    %52 = arith.addf %51, %50 : vector<8x128xf32>
    %53 = arith.divf %51, %52 : vector<8x128xf32>
    %54 = arith.mulf %48, %53 : vector<8x128xf32>
    %cst_32 = arith.constant 1.66666663 : f32
    %55 = vector.broadcast %cst_32 : f32 to vector<8x128xf32>
    %56 = arith.mulf %54, %55 : vector<8x128xf32>
    %c0_33 = arith.constant 0 : index
    %c0_34 = arith.constant 0 : index
    %57 = vector.load %arg9[%c0_33, %c0_34] : memref<128x128xf32, #tpu.memory_space<vmem>>, vector<128x128xf32>
    %cst_35 = arith.constant dense<0.000000e+00> : vector<8x128xf32>
    %58 = tpu.matmul %56, %57, %cst_35 {dimension_numbers = #tpu.dot_dimension_numbers<[1], [0], [0], [1], [0, 0, 1, 1], [], []>} : vector<8x128xf32>, vector<128x128xf32>, vector<8x128xf32> -> vector<8x128xf32>
    %59 = arith.negf %58 : vector<8x128xf32>
    %60 = math.exp %59 : vector<8x128xf32>
    %cst_36 = arith.constant 1.000000e+00 : f32
    %61 = vector.broadcast %cst_36 : f32 to vector<8x128xf32>
    %62 = arith.addf %61, %60 : vector<8x128xf32>
    %63 = arith.divf %61, %62 : vector<8x128xf32>
    %64 = arith.mulf %58, %63 : vector<8x128xf32>
    %cst_37 = arith.constant 1.66666663 : f32
    %65 = vector.broadcast %cst_37 : f32 to vector<8x128xf32>
    %66 = arith.mulf %64, %65 : vector<8x128xf32>
    %67 = arith.addf %46, %66 : vector<8x128xf32>
    %cst_38 = arith.constant 0.707106769 : f32
    %68 = vector.broadcast %cst_38 : f32 to vector<8x128xf32>
    %69 = arith.mulf %67, %68 : vector<8x128xf32>
    %c0_39 = arith.constant 0 : index
    %c0_40 = arith.constant 0 : index
    %c0_41 = arith.constant 0 : index
    %70 = vector.load %arg10[%c0_39, %c0_40, %c0_41] : memref<1x8x128xf32, #tpu.memory_space<vmem>>, vector<1x8x128xf32>
    %71 = vector.shape_cast %70 : vector<1x8x128xf32> to vector<8x128xf32>
    %72 = vector.shape_cast %69 : vector<8x128xf32> to vector<1x8x128xf32>
    tpu.vector_store %arg10[%c0_39, %c0_40, %c0_41], %72 {strides = array<i32>} : memref<1x8x128xf32, #tpu.memory_space<vmem>>, vector<1x8x128xf32>,
    return
  }
  func.func @transform_0(%arg0: i32) -> (i32, i32, i32) {
    %c0_i32 = arith.constant 0 : i32
    %c0_i32_0 = arith.constant 0 : i32
    %c0_i32_1 = arith.constant 0 : i32
    return %arg0, %c0_i32, %c0_i32_0 : i32, i32, i32
  }
  func.func @transform_1(%arg0: i32) -> (i32, i32, i32) {
    %c0_i32 = arith.constant 0 : i32
    %c0_i32_0 = arith.constant 0 : i32
    %c0_i32_1 = arith.constant 0 : i32
    return %arg0, %c0_i32, %c0_i32_0 : i32, i32, i32
  }
  func.func @transform_2(%arg0: i32) -> (i32, i32, i32) {
    %c0_i32 = arith.constant 0 : i32
    %c0_i32_0 = arith.constant 0 : i32
    %c0_i32_1 = arith.constant 0 : i32
    return %arg0, %c0_i32, %c0_i32_0 : i32, i32, i32
  }
  func.func @transform_3(%arg0: i32) -> (i32, i32) {
    %c0_i32 = arith.constant 0 : i32
    %c0_i32_0 = arith.constant 0 : i32
    %c0_i32_1 = arith.constant 0 : i32
    return %c0_i32, %c0_i32_0 : i32, i32
  }
  func.func @transform_4(%arg0: i32) -> (i32, i32) {
    %c0_i32 = arith.constant 0 : i32
    %c0_i32_0 = arith.constant 0 : i32
    %c0_i32_1 = arith.constant 0 : i32
    return %c0_i32, %c0_i32_0 : i32, i32
  }
  func.func @transform_5(%arg0: i32) -> (i32, i32) {
    %c0_i32 = arith.constant 0 : i32
    %c0_i32_0 = arith.constant 0 : i32
    %c0_i32_1 = arith.constant 0 : i32
    return %c0_i32, %c0_i32_0 : i32, i32
  }
  func.func @transform_6(%arg0: i32) -> (i32, i32) {
    %c0_i32 = arith.constant 0 : i32
    %c0_i32_0 = arith.constant 0 : i32
    %c0_i32_1 = arith.constant 0 : i32
    return %c0_i32, %c0_i32_0 : i32, i32
  }
  func.func @transform_7(%arg0: i32) -> (i32, i32) {
    %c0_i32 = arith.constant 0 : i32
    %c0_i32_0 = arith.constant 0 : i32
    %c0_i32_1 = arith.constant 0 : i32
    return %c0_i32, %c0_i32_0 : i32, i32
  }
  func.func @transform_8(%arg0: i32) -> (i32, i32) {
    %c0_i32 = arith.constant 0 : i32
    %c0_i32_0 = arith.constant 0 : i32
    %c0_i32_1 = arith.constant 0 : i32
    return %c0_i32, %c0_i32_0 : i32, i32
  }
  func.func @transform_9(%arg0: i32) -> (i32, i32, i32) {
    %c0_i32 = arith.constant 0 : i32
    %c0_i32_0 = arith.constant 0 : i32
    %c0_i32_1 = arith.constant 0 : i32
    return %arg0, %c0_i32, %c0_i32_0 : i32, i32, i32
  }
}

</mosaic_0001>

<bundles_post_ra>
// kernel: tpu_custom_call.1
= control target key start
LH: loop header
LB: loop body
LE: loop exit
PB: predicated region body
PF: predicated region fallthrough
CT: control target
= control target key end

     0   :  { %s3114_s0 = inlined_call_operand.vmem [shape: f32[2,8,128], index: 0, kind: input, shape index: {}]   ;;  %s3115_s1 = inlined_call_operand.hbm [shape: bf16[2,8,256], index: 1, kind: input, shape index: {}]   ;;  %s3116_s2 = inlined_call_operand.vmem [shape: bf16[2,256,8], index: 2, kind: input, shape index: {}]   ;;  %s3117_s3 = inlined_call_operand.vmem [shape: f32[256,128], index: 3, kind: input, shape index: {}]   ;;  %s3118_s4 = inlined_call_operand.hbm [shape: f32[128,128], index: 4, kind: input, shape index: {}]   ;;  %s3119_s5 = inlined_call_operand.hbm [shape: f32[128,128], index: 5, kind: input, shape index: {}]   ;;  %s3120_s6 = inlined_call_operand.hbm [shape: f32[128,128], index: 6, kind: input, shape index: {}]   ;;  %s3121_s7 = inlined_call_operand.hbm [shape: f32[128,128], index: 7, kind: input, shape index: {}]   ;;  %s3122_s8 = inlined_call_operand.hbm [shape: f32[128,128], index: 8, kind: input, shape index: {}]   ;;  %s3123_s9 = inlined_call_operand.hbm [shape: f32[2,8,128], index: 9, kind: output, shape index: {}]  }
   0x1   :  { %3128 = sst [smem:[#allocation19_spill]] %s3118_s4 }
   0x2   :  { %3129 = sst [smem:[#allocation20_spill]] %s3123_s9 }
   0x3   :  { %14 = vsyncpa [#allocation3], 0 }
   0x4   :  { %16 = vsyncpa [#allocation3 + $0x1], 0 }
   0x5   :  { %17 = vsyncpa [#allocation6], 0 }
   0x6   :  { %18 = vsyncpa [#allocation9], 0 }
   0x7   :  { %19 = vsyncpa [#allocation12], 0 }
   0x8   :  { %20 = vsyncpa [#allocation4], 0 }
   0x9   :  { %22 = vsyncpa [#allocation4 + $0x1], 0  ;;  %s2521_s30 = smov 0   ;;  %s2523_s10 = smov 0  }
   0xa   :  { %s2525_s11 = smov 0   ;;  %s2527_s12 = smov 0  }
   0xb LB: > { %s2459_s13 = smov [#allocation5]   ;;  %s2542_s15 = sadd.s32 4294967295, %s2457_s12   ;;  %s2457_s12 = sphi %s2527_s12, %s3153_s12   ;;  %s2453_s11 = sphi %s2525_s11, %s3152_s11   ;;  %s2449_s10 = sphi %s2523_s10, %s3151_s10   ;;  %s2445_s30 = sphi %s2521_s30, %s3150_s30  }
   0xc   : > { %s278_s14 = sshll.u32 %s2459_s13, 4  ;;  %p1549_p0 = scmp.ge.s32.totalorder %s2457_s12, 1  ;;  %s2547_s14 = int_to_ptr.vmem [resolvable:$true] %s278_s14 }
   0xd   : > { %p3125_p1 = scmp.eq.s32.totalorder %s2542_s15, 0  ;;  %p263_p2 = scmp.lt.s32.totalorder %s2457_s12, 3 }
   0xe   : > { %s2460_s17 = smov [#allocation8]   ;;  %s2461_s20 = smov [#allocation7]  }
   0xf   : > { %p2549_p3 = pnand %p1549_p0, %p263_p2  ;;  %s304_s18 = sshll.u32 %s2460_s17, 4  ;;  %s2562_s18 = int_to_ptr.vmem [resolvable:$true] %s304_s18 }
  0x10   : > { %s291_s21 = sshll.u32 %s2461_s20, 4  ;;  %s3132_s4 = sld [smem:[#allocation19_spill]]  ;;  %s2564_s21 = int_to_ptr.vmem [resolvable:$true] %s291_s21 }
  0x11   : > { %s3130_s16 = scalar_select %p2549_p3, 1, 0 }
  0x12   : > { %p2093_p5 = pneg %p2549_p3 }
  0x14   : > { %p2558_p6 = pnand %p2093_p5, %p3125_p1 }
  0x16   : > { %s2209_s24 = scalar_lea.hbm %s3132_s4, 2048  ;;  %p2574_p8 = pneg %p2558_p6 }
  0x17   : > { %p2210_p7 = scmp.ne.s32.totalorder %s3132_s4, %s2209_s24  ;;  %p2216_p11 = scmp.lt.u32.totalorder %s2209_s24, %s3132_s4 }
  0x19   : > { %p2212_p9 = pnand %p2574_p8, %p2210_p7 }
  0x1b   : > { %p2213_p10 = pneg %p2212_p9 }
  0x1d   : > { %p2218_p12 = pnand %p2216_p11, %p2213_p10 }
  0x1f   : > { %2221 = shalt.err (!%p2218_p12)
}
  0x20   : > { %s2222_s13 = scalar_lea.vmem %s2547_s14, 2048  ;;  %p2230_p5 = scmp.lt.s32.totalorder %s2547_s14, %s2547_s14 }
  0x21   : > { %p2223_p13 = scmp.ne.s32.totalorder %s2547_s14, %s2222_s13  ;;  %p2231_p4 = scmp.lt.s32.totalorder %s2222_s13, %s2222_s13 }
  0x23   : > { %p2225_p0 = pnand %p2223_p13, %p2574_p8  ;;  %p2232_p7 = por %p2231_p4, %p2230_p5 }
  0x25   : > { %p2226_p2 = pneg %p2225_p0 }
  0x27   : > { %p2233_p9 = pnand %p2232_p7, %p2226_p2 }
  0x29   : > { %2236 = shalt.err (!%p2233_p9)
}
  0x2a   : > { %s2462_s17 = smov 128   ;;  %s2463_s20 = smov 8  }
  0x2b   : > { %2096 = dma.hbm_to_vmem [thread:$0]  (!%p2558_p6), %s3132_s4, 2048, %s2547_s14, [#allocation6], %s2462_s17, %s2462_s17, %s2463_s20  }
  0x2c   : > { %s2237_s26 = scalar_lea.hbm %s3120_s6, 2048 }
  0x2d   : > { %p2238_p4 = scmp.ne.s32.totalorder %s3120_s6, %s2237_s26  ;;  %p2244_p12 = scmp.lt.u32.totalorder %s2237_s26, %s3120_s6 }
  0x2f   : > { %p2240_p10 = pnand %p2238_p4, %p2574_p8 }
  0x31   : > { %p2241_p11 = pneg %p2240_p10 }
  0x33   : > { %p2246_p13 = pnand %p2244_p12, %p2241_p11 }
  0x35   : > { %2249 = shalt.err (!%p2246_p13)
}
  0x36   : > { %s2250_s14 = scalar_lea.vmem %s2562_s18, 2048  ;;  %p2258_p7 = scmp.lt.s32.totalorder %s2562_s18, %s2562_s18 }
  0x37   : > { %p2251_p0 = scmp.ne.s32.totalorder %s2562_s18, %s2250_s14  ;;  %p2259_p9 = scmp.lt.s32.totalorder %s2250_s14, %s2250_s14 }
  0x39   : > { %p2253_p2 = pnand %p2251_p0, %p2574_p8  ;;  %p2260_p4 = por %p2259_p9, %p2258_p7 }
  0x3b   : > { %p2254_p5 = pneg %p2253_p2 }
  0x3d   : > { %p2261_p10 = pnand %p2260_p4, %p2254_p5 }
  0x3f   : > { %2264 = shalt.err (!%p2261_p10)
}
  0x40   : > { %2102 = dma.hbm_to_vmem [thread:$0]  (!%p2558_p6), %s3120_s6, 2048, %s2562_s18, [#allocation9], %s2462_s17, %s2462_s17, %s2463_s20  }
  0x41   : > { %s2265_s25 = scalar_lea.hbm %s3119_s5, 2048 }
  0x42   : > { %p2266_p11 = scmp.ne.s32.totalorder %s3119_s5, %s2265_s25  ;;  %p2272_p0 = scmp.lt.u32.totalorder %s2265_s25, %s3119_s5 }
  0x44   : > { %p2268_p12 = pnand %p2266_p11, %p2574_p8 }
  0x46   : > { %p2269_p13 = pneg %p2268_p12 }
  0x48   : > { %p2274_p2 = pnand %p2272_p0, %p2269_p13 }
  0x4a   : > { %2277 = shalt.err (!%p2274_p2)
}
  0x4b   : > { %s2278_s18 = scalar_lea.vmem %s2564_s21, 2048  ;;  %p2286_p4 = scmp.lt.s32.totalorder %s2564_s21, %s2564_s21 }
  0x4c   : > { %p2279_p5 = scmp.ne.s32.totalorder %s2564_s21, %s2278_s18  ;;  %p2287_p10 = scmp.lt.s32.totalorder %s2278_s18, %s2278_s18 }
  0x4e   : > { %p2281_p7 = pnand %p2279_p5, %p2574_p8  ;;  %p2288_p11 = por %p2287_p10, %p2286_p4 }
  0x50   : > { %p2282_p9 = pneg %p2281_p7 }
  0x52   : > { %p2289_p12 = pnand %p2288_p11, %p2282_p9 }
  0x54   : > { %2292 = shalt.err (!%p2289_p12)
}
  0x55   : > { %2099 = dma.hbm_to_vmem [thread:$0]  (!%p2558_p6), %s3119_s5, 2048, %s2564_s21, [#allocation6], %s2462_s17, %s2462_s17, %s2463_s20  }
  0x56   : > { %s2464_s22 = smov [#allocation10]   ;;  %s2465_s24 = smov [#allocation11]  }
  0x57   : > { %s317_s23 = sshll.u32 %s2464_s22, 4  ;;  %s330_s25 = sshll.u32 %s2465_s24, 4  ;;  %s318_s23 = int_to_ptr.vmem [resolvable:$true] %s317_s23  ;;  %s331_s25 = int_to_ptr.vmem [resolvable:$true] %s330_s25 }
  0x58   : > { %s2293_s29 = scalar_lea.hbm %s3121_s7, 2048 }
  0x59   : > { %p2294_p13 = scmp.ne.s32.totalorder %s3121_s7, %s2293_s29  ;;  %p2300_p5 = scmp.lt.u32.totalorder %s2293_s29, %s3121_s7 }
  0x5b   : > { %p2296_p0 = pnand %p2294_p13, %p2574_p8 }
  0x5d   : > { %p2297_p2 = pneg %p2296_p0 }
  0x5f   : > { %p2302_p7 = pnand %p2300_p5, %p2297_p2 }
  0x61   : > { %2305 = shalt.err (!%p2302_p7)
}
  0x62   : > { %s2306_s21 = scalar_lea.vmem %s318_s23, 2048  ;;  %p2314_p11 = scmp.lt.s32.totalorder %s318_s23, %s318_s23 }
  0x63   : > { %p2307_p9 = scmp.ne.s32.totalorder %s318_s23, %s2306_s21  ;;  %p2315_p12 = scmp.lt.s32.totalorder %s2306_s21, %s2306_s21 }
  0x65   : > { %p2309_p4 = pnand %p2307_p9, %p2574_p8  ;;  %p2316_p1 = por %p2315_p12, %p2314_p11 }
  0x67   : > { %p2310_p10 = pneg %p2309_p4 }
  0x69   : > { %p2317_p3 = pnand %p2316_p1, %p2310_p10 }
  0x6b   : > { %2320 = shalt.err (!%p2317_p3)
}
  0x6c   : > { %2105 = dma.hbm_to_vmem [thread:$0]  (!%p2558_p6), %s3121_s7, 2048, %s318_s23, [#allocation9], %s2462_s17, %s2462_s17, %s2463_s20  }
  0x6d   : > { %s2321_s26 = scalar_lea.hbm %s3122_s8, 2048 }
  0x6e   : > { %p2322_p1 = scmp.ne.s32.totalorder %s3122_s8, %s2321_s26  ;;  %p2328_p0 = scmp.lt.u32.totalorder %s2321_s26, %s3122_s8 }
  0x70   : > { %p2324_p3 = pnand %p2322_p1, %p2574_p8 }
  0x72   : > { %p2325_p13 = pneg %p2324_p3 }
  0x74   : > { %p2330_p2 = pnand %p2328_p0, %p2325_p13 }
  0x76   : > { %2333 = shalt.err (!%p2330_p2)
}
  0x77   : > { %s2334_s14 = scalar_lea.vmem %s331_s25, 2048  ;;  %p2342_p4 = scmp.lt.s32.totalorder %s331_s25, %s331_s25 }
  0x78   : > { %p2335_p5 = scmp.ne.s32.totalorder %s331_s25, %s2334_s14  ;;  %p2343_p10 = scmp.lt.s32.totalorder %s2334_s14, %s2334_s14 }
  0x7a   : > { %p2337_p7 = pnand %p2335_p5, %p2574_p8  ;;  %p2344_p11 = por %p2343_p10, %p2342_p4 }
  0x7c   : > { %p2338_p9 = pneg %p2337_p7 }
  0x7e   : > { %p2345_p12 = pnand %p2344_p11, %p2338_p9 }
  0x80   : > { %2348 = shalt.err (!%p2345_p12)
}
  0x81   : > { %2108 = dma.hbm_to_vmem [thread:$0]  (!%p2558_p6), %s3122_s8, 2048, %s331_s25, [#allocation12], %s2462_s17, %s2462_s17, %s2463_s20  }
  0x82   : > { %s1548_s19 = sadd.s32 4294967294, %s2457_s12   ;;  %s2694_s27 = sadd.s32 1, %s2457_s12  }
  0x83   : > { %s61_s4 = sadd.s32 1, %s2453_s11  ;;  %s58_s9 = ssub.s32 %s2457_s12, %s2694_s27 }
  0x84   : > { %p68_p8 = scmp.ne.s32.totalorder %s2453_s11, %s2449_s10  ;;  %p59_p1 = scmp.eq.s32.totalorder %s58_s9, 0 }
  0x85   : > { %p69_p3 = scmp.eq.s32.totalorder %s2457_s12, 0  ;;  %p74_p13 = scmp.ne.s32.totalorder %s2449_s10, %s2445_s30 }
  0x86   : > { %p250_p0 = scmp.eq.s32.totalorder %s2542_s15, 1  ;;  %p3134_p5 = scmp.eq.s32.totalorder %s2542_s15, 0 }
  0x87   : > { %s2706_s22 = scalar_select %p59_p1, %s2453_s11, %s61_s4  }
  0x88   : > { %p70_p2 = por %p69_p3, %p68_p8  ;;  %p2710_p7 = por %p3134_p5, %p74_p13 }
  0x89   : > { %p2714_p6 = por %p250_p0, %p68_p8  ;;  %p256_p9 = scmp.eq.s32.totalorder %s1548_s19, 1 }
  0x8a   : > { %p2122_p4 = scmp.lt.s32.totalorder %s2457_s12, 2  ;;  %s351_s20 = sand.u32 1, %s2453_s11  }
  0x8b   : > { %s3136_s17 = scalar_select %p2714_p6, 1, 0 }
  0x8c   : > { %p2720_p10 = por %p256_p9, %p74_p13  ;;  %s1556_s26 = sshll.u32 %s351_s20, 3 }
  0x8d   : > { %s1613_s28 = sshll.u32 %s2457_s12, 7  ;;  %s355_s14 = scalar_lea.vmem [#allocation2], %s1556_s26 }
  0x8e   : > { %s3137_s25 = scalar_select %p2720_p10, 1, 0 }
  0x8f   : > { %s2728_s18 = scalar_lea.hbm %s3115_s1, %s1613_s28  ;;  %s363_s23 = sshll.u32 %s355_s14, 4  ;;  %s2734_s23 = int_to_ptr.vmem [resolvable:$true] %s363_s23 }
  0x90   : > { %p2730_p11 = pnand %p2122_p4, %p70_p2  ;;  %s352_s19 = scalar_lea.sflag [#allocation3], %s351_s20 }
  0x91   : > { %s2349_s4 = scalar_lea.hbm %s2728_s18, 128  ;;  %s2354_s28 = scalar_lea.hbm %s3115_s1, 256 }
  0x92   : > { %p2350_p12 = scmp.ne.s32.totalorder %s2728_s18, %s2349_s4  ;;  %p2351_p8 = pneg %p2730_p11 }
  0x93   : > { %p2355_p13 = scmp.lt.u32.totalorder %s2728_s18, %s3115_s1  ;;  %p2356_p0 = scmp.lt.u32.totalorder %s2354_s28, %s2349_s4 }
  0x94   : > { %p2352_p1 = pnand %p2351_p8, %p2350_p12  ;;  %p2358_p5 = scmp.lt.u32.totalorder %s2349_s4, %s2728_s18 }
  0x95   : > { %p2357_p2 = por %p2356_p0, %p2355_p13 }
  0x96   : > { %p2353_p3 = pneg %p2352_p1 }
  0x97   : > { %p2359_p9 = por %p2358_p5, %p2357_p2 }
  0x99   : > { %p2360_p4 = pnand %p2359_p9, %p2353_p3 }
  0x9b   : > { %2363 = shalt.err (!%p2360_p4)
}
  0x9c   : > { %s2364_s20 = scalar_lea.vmem %s2734_s23, 128  ;;  %s2466_s14 = smov [#allocation2]  }
  0x9d   : > { %p2365_p12 = scmp.ne.s32.totalorder %s2734_s23, %s2364_s20  ;;  %s2369_s9 = sshll.u32 %s2466_s14, 4  ;;  %s2370_s9 = int_to_ptr.vmem [resolvable:$false] %s2369_s9 }
  0x9e   : > { %s2371_s26 = scalar_lea.vmem %s2370_s9, 256  ;;  %p2372_p6 = scmp.lt.s32.totalorder %s2734_s23, %s2370_s9 }
  0x9f   : > { %p2367_p1 = pnand %p2365_p12, %p2351_p8  ;;  %p2373_p13 = scmp.lt.s32.totalorder %s2371_s26, %s2364_s20 }
  0xa1   : > { %p2368_p10 = pneg %p2367_p1  ;;  %p2374_p0 = por %p2373_p13, %p2372_p6 }
  0xa3   : > { %p2375_p2 = pnand %p2374_p0, %p2368_p10 }
  0xa5   : > { %2378 = shalt.err (!%p2375_p2)
}
  0xa6   : > { %2112 = dma.hbm_to_vmem [thread:$0]  (!%p2730_p11), %s2728_s18, 128, %s2734_s23, %s352_s19  }
  0xa7   : > { %p3139_p3 = scmp.ne.s32.totalorder %s3130_s16, 0 }
  0xa8   : > { %s2764_s4 = sand.u32 (!%p3139_p3), 1, %s2449_s10  }
  0xa9   : > { %380 = sbr.rel (%p3139_p3) target bundleno = 1958 (0x7a6), region = 56  ;;  %s1560_s28 = sshll.u32 (!%p3139_p3), %s2764_s4, 3 }
  0xaa   : > { %s383_s29 = scalar_lea.sflag (!%p3139_p3), [#allocation3], %s2764_s4  ;;  %s2770_s13 = scalar_lea.vmem (!%p3139_p3), [#allocation2], %s1560_s28 }
  0xb0   : > { %2424 = dma.done.wait (%p2710_p7), %s383_s29, 128  }
  0xb1   : > { %2426 = vsyncadd (%p2710_p7), %s383_s29, 4294967168  ;;  %p3140_p6 = scmp.eq.s32.totalorder %s2542_s15, 0 }
  0xb3   : > { %2428 = dma.done.wait (%p3140_p6), [#allocation6], 4096   ;;  %p3141_p10 = pmov %p3140_p6 }
  0xb4   : > { %p3142_p11 = pmov %p3140_p6 }
  0xb5   : > { %2430 = vsyncadd (%p3141_p10), [#allocation6], 4294963200 }
  0xb6   : > { %2432 = dma.done.wait (%p3142_p11), [#allocation9], 4096   ;;  %p3143_p8 = pmov %p3140_p6 }
  0xb7   : > { %p3144_p5 = pmov %p3140_p6 }
  0xb8   : > { %2434 = vsyncadd (%p3143_p8), [#allocation9], 4294963200 }
  0xb9   : > { %2436 = dma.done.wait (%p3144_p5), [#allocation12], 2048   ;;  %p3145_p9 = pmov %p3144_p5 }
  0xba   : > { %v2467_v0 = vmov 0.0|0.0   ;;  %vm2468_vm0 = vmmov 0   ;;  %v2469_v1 = vmov 0.0   ;;  %p450_p7 = scmp.lt.s32.totalorder %s2542_s15, 1  ;;  %v461_v2 = vld [vmem:[#allocation5] sm:$0xff]  ;;  %v462_v3 = vld [vmem:[#allocation5 + $0x8] sm:$0xff] }
  0xbb   : > { %2438 = vsyncadd (%p3145_p9), [#allocation12], 4294965248  ;;  %1948 = vmatprep.subr.bf16.mxu0 %v2467_v0  ;;  %1771 = vmatprep.mubr.msk.f32.mxu0 %vm2468_vm0, %v2469_v1  ;;  %v463_v4 = vld [vmem:[#allocation5 + $0x10] sm:$0xff]  ;;  %v1949_v5 = vpack.c.bf16 %v462_v3, %v461_v2  ;;  %v464_v6 = vld [vmem:[#allocation5 + $0x18] sm:$0xff]  ;;  %vm764_vm1 = vcmask 64512   ;;  %vm813_vm2 = vcmask 1043456  }
  0xbc   : > { %1972 = vmatprep.subr.bf16.mxu1 %v2467_v0  ;;  %1806 = vmatprep.mubr.msk.f32.mxu1 %vm2468_vm0, %v2469_v1  ;;  %s2796_s16 = scalar_select %p450_p7, %s2542_s15, 1  ;;  %v1952_v7 = vpack.c.bf16 %v464_v6, %v463_v4  ;;  %v465_v8 = vld [vmem:[#allocation5 + $0x20] sm:$0xff]  ;;  %v466_v9 = vld [vmem:[#allocation5 + $0x28] sm:$0xff]  ;;  %v467_v10 = vld [vmem:[#allocation5 + $0x30] sm:$0xff] }
  0xbd   : > { %1950 = vmatpush3.bf16.msra.mxu0 %v1949_v5  ;;  %v468_v11 = vld [vmem:[#allocation5 + $0x38] sm:$0xff]  ;;  %v1955_v12 = vpack.c.bf16 %v466_v9, %v465_v8  ;;  %v469_v13 = vld [vmem:[#allocation5 + $0x40] sm:$0xff]  ;;  %v470_v14 = vld [vmem:[#allocation5 + $0x48] sm:$0xff]  ;;  %s1610_s18 = sshll.u32 %s2542_s15, 7  ;;  %s449_s23 = scalar_lea.vmem [#allocation13], %s1560_s28 }
  0xbe   : > { %s1614_s24 = sshll.u32 %s2796_s16, 7  ;;  %1951 = vmatprep.subr.bf16.mxu0 %v2467_v0  ;;  %v1958_v15 = vpack.c.bf16 %v468_v11, %v467_v10  ;;  %v1961_v16 = vpack.c.bf16 %v470_v14, %v469_v13  ;;  %v471_v17 = vld [vmem:[#allocation5 + $0x50] sm:$0xff]  ;;  %v472_v18 = vld [vmem:[#allocation5 + $0x58] sm:$0xff]  ;;  %v473_v20 = vld [vmem:[#allocation5 + $0x60] sm:$0xff]  ;;  %s1567_s19 = sshll.u32 %s2796_s16, 3 }
  0xbf   : > { %s2803_s21 = scalar_lea.vmem %s3116_s2, %s1614_s24  ;;  %v1964_v19 = vpack.c.bf16 %v472_v18, %v471_v17  ;;  %v474_v21 = vld [vmem:[#allocation5 + $0x68] sm:$0xff]  ;;  %v475_v23 = vld [vmem:[#allocation5 + $0x70] sm:$0xff]  ;;  %v476_v24 = vld [vmem:[#allocation5 + $0x78] sm:$0xff]  ;;  %s453_s9 = scalar_lea.vmem %s3114_s0, %s1567_s19 }
  0xc0   : > { %v1967_v22 = vpack.c.bf16 %v474_v21, %v473_v20  ;;  %v1970_v25 = vpack.c.bf16 %v476_v24, %v475_v23  ;;  %v2815_v26 = vld [vmem:[%s453_s9] sm:$0xff]  ;;  %v555_v27 = vld [vmem:[#allocation7] sm:$0xff]  ;;  %v556_v28 = vld [vmem:[#allocation7 + $0x8] sm:$0xff]  ;;  %s3146_s20 = sld [smem:[#allocation20_spill]]  ;;  %s1393_s9 = scalar_lea.sflag [#allocation4], %s2764_s4 }
  0xc1   : > { %1953 = vmatpush3.bf16.msra.mxu0 %v1952_v7  ;;  %v1973_v29 = vpack.c.bf16 %v556_v28, %v555_v27  ;;  %v557_v30 = vld [vmem:[#allocation7 + $0x10] sm:$0xff]  ;;  %v558_v31 = vld [vmem:[#allocation7 + $0x18] sm:$0xff]  ;;  %v559_v33 = vld [vmem:[#allocation7 + $0x20] sm:$0xff]  ;;  %p3147_p12 = scmp.ne.s32.totalorder %s3136_s17, 0  ;;  %s2470_s15 = smov [#allocation13]  }
  0xc2   : > { %1954 = vmatprep.subr.bf16.mxu0 %v2467_v0  ;;  %v1976_v32 = vpack.c.bf16 %v558_v31, %v557_v30  ;;  %v560_v34 = vld [vmem:[#allocation7 + $0x28] sm:$0xff]  ;;  %v561_v36 = vld [vmem:[#allocation7 + $0x30] sm:$0xff]  ;;  %v562_v37 = vld [vmem:[#allocation7 + $0x38] sm:$0xff]  ;;  %s2383_s28 = sshll.u32 %s2470_s15, 4  ;;  %s2384_s28 = int_to_ptr.vmem [resolvable:$false] %s2383_s28 }
  0xc3   : > { %1974 = vmatpush3.bf16.msra.mxu1 %v1973_v29  ;;  %v1979_v35 = vpack.c.bf16 %v560_v34, %v559_v33  ;;  %v1982_v38 = vpack.c.bf16 %v562_v37, %v561_v36  ;;  %v563_v39 = vld [vmem:[#allocation7 + $0x40] sm:$0xff]  ;;  %v564_v40 = vld [vmem:[#allocation7 + $0x48] sm:$0xff]  ;;  %v565_v42 = vld [vmem:[#allocation7 + $0x50] sm:$0xff]  ;;  %s2385_s29 = scalar_lea.vmem %s2384_s28, 256 }
  0xc4   : > { %1975 = vmatprep.subr.bf16.mxu1 %v2467_v0  ;;  %v1985_v41 = vpack.c.bf16 %v564_v40, %v563_v39  ;;  %v566_v43 = vld [vmem:[#allocation7 + $0x58] sm:$0xff]  ;;  %v567_v45 = vld [vmem:[#allocation7 + $0x60] sm:$0xff]  ;;  %v568_v46 = vld [vmem:[#allocation7 + $0x68] sm:$0xff] }
  0xc5   : > { %1956 = vmatpush3.bf16.msra.mxu0 %v1955_v12  ;;  %v1988_v44 = vpack.c.bf16 %v566_v43, %v565_v42  ;;  %v1991_v47 = vpack.c.bf16 %v568_v46, %v567_v45  ;;  %v569_v48 = vld [vmem:[#allocation7 + $0x70] sm:$0xff]  ;;  %v570_v49 = vld [vmem:[#allocation7 + $0x78] sm:$0xff]  ;;  %v2173_v11 = vld [vmem:[%s2803_s21 + $0x10] sm:$0xff]  }
  0xc6   : > { %1957 = vmatprep.subr.bf16.mxu0 %v2467_v0  ;;  %v1994_v50 = vpack.c.bf16 %v570_v49, %v569_v48  ;;  %v2171_v59 = vld [vmem:[%s2803_s21] sm:$0xff]   ;;  %v2172_v10 = vld [vmem:[%s2803_s21 + $0x8] sm:$0xff]   ;;  %v2174_v12 = vld [vmem:[%s2803_s21 + $0x18] sm:$0xff]   ;;  %s3070_s14 = scalar_lea.hbm %s3146_s20, %s1610_s18 }
  0xc7   : > { %1977 = vmatpush3.bf16.msra.mxu1 %v1976_v32  ;;  %v2175_v13 = vld [vmem:[%s2803_s21 + $0x20] sm:$0xff]   ;;  %v2176_v14 = vld [vmem:[%s2803_s21 + $0x28] sm:$0xff]   ;;  %v2182_v20 = vld [vmem:[%s2803_s21 + $0x58] sm:$0xff]  }
  0xc8   : > { %1978 = vmatprep.subr.bf16.mxu1 %v2467_v0  ;;  %v2179_v17 = vld [vmem:[%s2803_s21 + $0x40] sm:$0xff]   ;;  %v2180_v18 = vld [vmem:[%s2803_s21 + $0x48] sm:$0xff]   ;;  %v2185_v23 = vld [vmem:[%s2803_s21 + $0x70] sm:$0xff]  }
  0xc9   : > { %1959 = vmatpush3.bf16.msra.mxu0 %v1958_v15  ;;  %v2177_v15 = vld [vmem:[%s2803_s21 + $0x30] sm:$0xff]   ;;  %v2183_v21 = vld [vmem:[%s2803_s21 + $0x60] sm:$0xff]   ;;  %v2186_v24 = vld [vmem:[%s2803_s21 + $0x78] sm:$0xff]  }
  0xca   : > { %1960 = vmatprep.subr.bf16.mxu0 %v2467_v0  ;;  %v980_v28 = vld [vmem:[%s3117_s3 + $0x10] sm:$0xff]  ;;  %v981_v29 = vld [vmem:[%s3117_s3 + $0x18] sm:$0xff]  ;;  %v978_v31 = vld [vmem:[%s3117_s3] sm:$0xff] }
  0xcb   : > { %1980 = vmatpush3.bf16.msra.mxu1 %v1979_v35  ;;  %v979_v32 = vld [vmem:[%s3117_s3 + $0x8] sm:$0xff]  ;;  %v984_v42 = vld [vmem:[%s3117_s3 + $0x30] sm:$0xff]  ;;  %v985_v43 = vld [vmem:[%s3117_s3 + $0x38] sm:$0xff] }
  0xcc   : > { %1981 = vmatprep.subr.bf16.mxu1 %v2467_v0  ;;  %v982_v45 = vld [vmem:[%s3117_s3 + $0x20] sm:$0xff]  ;;  %v983_v46 = vld [vmem:[%s3117_s3 + $0x28] sm:$0xff] }
  0xcd   : > { %1962 = vmatpush3.bf16.msra.mxu0 %v1961_v16  ;;  %v2178_v16 = vld [vmem:[%s2803_s21 + $0x38] sm:$0xff]  }
  0xce   : > { %1963 = vmatprep.subr.bf16.mxu0 %v2467_v0 }
  0xcf   : > { %1983 = vmatpush3.bf16.msra.mxu1 %v1982_v38 }
  0xd0   : > { %1984 = vmatprep.subr.bf16.mxu1 %v2467_v0 }
  0xd1   : > { %1965 = vmatpush3.bf16.msra.mxu0 %v1964_v19  ;;  %v2181_v19 = vld [vmem:[%s2803_s21 + $0x50] sm:$0xff]  }
  0xd2   : > { %1966 = vmatprep.subr.bf16.mxu0 %v2467_v0 }
  0xd3   : > { %1986 = vmatpush3.bf16.msra.mxu1 %v1985_v41 }
  0xd4   : > { %1987 = vmatprep.subr.bf16.mxu1 %v2467_v0 }
  0xd5   : > { %1968 = vmatpush3.bf16.msra.mxu0 %v1967_v22  ;;  %v2184_v22 = vld [vmem:[%s2803_s21 + $0x68] sm:$0xff]  }
  0xd6   : > { %1969 = vmatprep.subr.bf16.mxu0 %v2467_v0 }
  0xd7   : > { %1989 = vmatpush3.bf16.msra.mxu1 %v1988_v44 }
  0xd8   : > { %1990 = vmatprep.subr.bf16.mxu1 %v2467_v0 }
  0xd9   : > { %1971 = vmatpush3.bf16.msra.mxu0 %v1970_v25  ;;  %v2862_v25 = vld [vmem:[%s2770_s13] sm:$0xff]  ;;  %s1406_s13 = sshll.u32 %s449_s23, 4  ;;  %s3072_s13 = int_to_ptr.vmem [resolvable:$true] %s1406_s13 }
  0xda   : > { %s2379_s26 = scalar_lea.vmem %s3072_s13, 128  ;;  %p2386_p0 = scmp.lt.s32.totalorder %s3072_s13, %s2384_s28 }
  0xdb   : > { %1992 = vmatpush3.bf16.msra.mxu1 %v1991_v47  ;;  %p2380_p4 = scmp.ne.s32.totalorder %s3072_s13, %s2379_s26  ;;  %p2387_p2 = scmp.lt.s32.totalorder %s2385_s29, %s2379_s26 }
  0xdc   : > { %1772 = vmatmul.mubr.f32.vlgmr.msra.gmra.mrb[0].mxu0 %v2815_v26  ;;  %1993 = vmatprep.subr.bf16.mxu1 %v2467_v0 }
  0xdd   : > { %1811 = vmatprep.mubr.msk.bf16.mxu0 %vm764_vm1, %v2171_v59  ;;  %v986_v59 = vld [vmem:[%s3117_s3 + $0x40] sm:$0xff]  ;;  %p2381_p1 = pnand %p2380_p4, %p3147_p12  ;;  %p2388_p3 = por %p2387_p2, %p2386_p0 }
  0xdf   : > { %1995 = vmatpush3.bf16.msra.mxu1 %v1994_v50  ;;  %p2382_p13 = pneg %p2381_p1 }
  0xe1   : > { %p2389_p6 = pnand %p2388_p3, %p2382_p13 }
 0x1af   : > { %v543_v51 = vpop.f32.mrb[0].mxu0 }
 0x1b0   : > { %v1570_v52 = vmul.f32 -1.442695, %v543_v51  ;;  %v1773_v53 = vpop.f32.mrb[1].mxu0 }
 0x1b2   : > { %2189 = vpow2.f32 %v1570_v52 }
 0x1bc   : > { %v2190_v54 = vpop.eup %2189 }
 0x1bd   : > { %v550_v55 = vadd.f32 1.0, %v2190_v54 }
 0x1bf   : > { %2191 = vrcp.f32 %v550_v55 }
 0x1c9   : > { %v2192_v56 = vpop.eup %2191 }
 0x1ca   : > { %v553_v57 = vmul.f32 %v2192_v56, %v543_v51  ;;  %v988_v56 = vld [vmem:[%s3117_s3 + $0x50] sm:$0xff] }
 0x1cc   : > { %v554_v58 = vmul.f32 1.6666666, %v553_v57  ;;  %v989_v57 = vld [vmem:[%s3117_s3 + $0x58] sm:$0xff] }
 0x1ce   : > { %1807 = vmatmul.mubr.f32.vlgmr.msra.gmra.mrb[0].mxu1 %v554_v58 }
 0x2a1   : > { %v637_v60 = vpop.f32.mrb[0].mxu1 }
 0x2a2   : > { %v1571_v61 = vmul.f32 -1.442695, %v637_v60  ;;  %v1808_v62 = vpop.f32.mrb[1].mxu1 }
 0x2a4   : > { %2193 = vpow2.f32 %v1571_v61 }
 0x2ae   : > { %v2194_v63 = vpop.eup %2193 }
 0x2af   : > { %v644_v2 = vadd.f32 1.0, %v2194_v63 }
 0x2b1   : > { %2195 = vrcp.f32 %v644_v2 }
 0x2bb   : > { %v2196_v3 = vpop.eup %2195 }
 0x2bc   : > { %v647_v4 = vmul.f32 %v2196_v3, %v637_v60  ;;  %v987_v60 = vld [vmem:[%s3117_s3 + $0x48] sm:$0xff] }
 0x2be   : > { %v648_v5 = vmul.f32 1.6666666, %v647_v4 }
 0x2c0   : > { %v649_v6 = vadd.f32 %v648_v5, %v2815_v26  ;;  %v1605_v26 = vcombine.high %v2862_v25, %v2862_v25 }
 0x2c2   : > { %v650_v7 = vmul.f32 0.70710677, %v649_v6  ;;  %1098 = vmatprep.mubr.bf16.mxu1 %v1605_v26  ;;  %v994_v26 = vld [vmem:[%s3117_s3 + $0x80] sm:$0xff] }
 0x2c4   : > { %v651_v8 = vpack.c.bf16 %v650_v7, %v650_v7 }
 0x2c6   : > { %2068 = vmatprep.subr.msk.bf16.mxu0 %vm813_vm2, %v651_v8  ;;  %v815_v9 = vsel %vm813_vm2, %v651_v8, 0  ;;  %v992_v8 = vld [vmem:[%s3117_s3 + $0x70] sm:$0xff] }
 0x2c7   : > { %1810 = vmatpush3.bf16.msra.mxu0 %v815_v9  ;;  %v993_v9 = vld [vmem:[%s3117_s3 + $0x78] sm:$0xff] }
 0x2c8   : > { %2020 = vmatprep.subr.bf16.mxu0 %v2467_v0 }
 0x2ca   : > { %1812 = vmatmul.mubr.msk.bf16.vlgmr.msra.gmra.mrb[4].mxu0 %vm764_vm1, %v2172_v10 }
 0x2cb   : > { %1815 = vmatprep.mubr.msk.bf16.mxu0 %vm764_vm1, %v2173_v11  ;;  %v990_v11 = vld [vmem:[%s3117_s3 + $0x60] sm:$0xff] }
 0x2d2   : > { %1816 = vmatmul.mubr.msk.bf16.gmra.mrb[8].mxu0 %vm764_vm1, %v2174_v12  ;;  %v991_v12 = vld [vmem:[%s3117_s3 + $0x68] sm:$0xff] }
 0x2d3   : > { %1819 = vmatprep.mubr.msk.bf16.mxu0 %vm764_vm1, %v2175_v13 }
 0x2da   : > { %1820 = vmatmul.mubr.msk.bf16.gmra.mrb[12].mxu0 %vm764_vm1, %v2176_v14 }
 0x2db   : > { %1823 = vmatprep.mubr.msk.bf16.mxu0 %vm764_vm1, %v2177_v15 }
 0x2e2   : > { %1824 = vmatmul.mubr.msk.bf16.gmra.mrb[16].mxu0 %vm764_vm1, %v2178_v16 }
 0x2e3   : > { %1827 = vmatprep.mubr.msk.bf16.mxu0 %vm764_vm1, %v2179_v17 }
 0x2ea   : > { %1828 = vmatmul.mubr.msk.bf16.gmra.mrb[20].mxu0 %vm764_vm1, %v2180_v18 }
 0x2eb   : > { %1831 = vmatprep.mubr.msk.bf16.mxu0 %vm764_vm1, %v2181_v19 }
 0x2f2   : > { %1832 = vmatmul.mubr.msk.bf16.gmra.mrb[24].mxu0 %vm764_vm1, %v2182_v20 }
 0x2f3   : > { %1835 = vmatprep.mubr.msk.bf16.mxu0 %vm764_vm1, %v2183_v21 }
 0x2fa   : > { %1836 = vmatmul.mubr.msk.bf16.gmra.mrb[28].mxu0 %vm764_vm1, %v2184_v22  ;;  %v996_v22 = vld [vmem:[%s3117_s3 + $0x90] sm:$0xff] }
 0x2fb   : > { %1839 = vmatprep.mubr.msk.bf16.mxu0 %vm764_vm1, %v2185_v23  ;;  %v997_v23 = vld [vmem:[%s3117_s3 + $0x98] sm:$0xff] }
 0x302   : > { %1840 = vmatmul.mubr.msk.bf16.gmra.mrb[32].mxu0 %vm764_vm1, %v2186_v24 }
 0x303   : > { %1910 = vmatprep.mubr.msk.f32.mxu0 %vm2468_vm0, %v2469_v1 }
 0x39d   : > { %v1813_v27 = vpop.f32.mrb[4].mxu0 }
 0x39e   : > { %v851_v30 = vpop.f32.mrb[5].mxu0  ;;  %v2878_v34 = vmul.f32 %v1813_v27, %v980_v28  ;;  %v995_v27 = vld [vmem:[%s3117_s3 + $0x88] sm:$0xff] }
 0x39f   : > { %v1814_v33 = vpop.f32.mrb[6].mxu0  ;;  %v2882_v37 = vmul.f32 %v978_v31, %v851_v30 }
 0x3a0   : > { %v2880_v35 = vmul.f32 %v1814_v33, %v981_v29  ;;  %v854_v36 = vpop.f32.mrb[7].mxu0 }
 0x3a1   : > { %v2884_v38 = vmul.f32 %v979_v32, %v854_v36 }
 0x3a2   : > { %v1043_v39 = vpack.c.bf16 %v2880_v35, %v2878_v34  ;;  %v1003_v34 = vld [vmem:[%s3117_s3 + $0xc8] sm:$0xff] }
 0x3a3   : > { %v1042_v40 = vpack.c.bf16 %v2884_v38, %v2882_v37 }
 0x3a5   : > { %v1817_v41 = vpop.f32.mrb[8].mxu0 }
 0x3a6   : > { %v867_v44 = vpop.f32.mrb[9].mxu0  ;;  %v2902_v48 = vmul.f32 %v1817_v41, %v984_v42  ;;  %v1000_v41 = vld [vmem:[%s3117_s3 + $0xb0] sm:$0xff]  ;;  %v1001_v42 = vld [vmem:[%s3117_s3 + $0xb8] sm:$0xff] }
 0x3a7   : > { %v1818_v47 = vpop.f32.mrb[10].mxu0  ;;  %v2906_v51 = vmul.f32 %v982_v45, %v867_v44  ;;  %v998_v44 = vld [vmem:[%s3117_s3 + $0xa0] sm:$0xff]  ;;  %v999_v45 = vld [vmem:[%s3117_s3 + $0xa8] sm:$0xff] }
 0x3a8   : > { %v2904_v49 = vmul.f32 %v1818_v47, %v985_v43  ;;  %v870_v50 = vpop.f32.mrb[11].mxu0 }
 0x3a9   : > { %v2908_v52 = vmul.f32 %v983_v46, %v870_v50 }
 0x3aa   : > { %v1045_v53 = vpack.c.bf16 %v2904_v49, %v2902_v48  ;;  %v1007_v48 = vld [vmem:[%s3117_s3 + $0xe8] sm:$0xff] }
 0x3ab   : > { %v1044_v54 = vpack.c.bf16 %v2908_v52, %v2906_v51  ;;  %v1008_v51 = vld [vmem:[%s3117_s3 + $0xf0] sm:$0xff]  ;;  %v1009_v52 = vld [vmem:[%s3117_s3 + $0xf8] sm:$0xff] }
 0x3ad   : > { %v1821_v55 = vpop.f32.mrb[12].mxu0 }
 0x3ae   : > { %v883_v58 = vpop.f32.mrb[13].mxu0  ;;  %v2926_v62 = vmul.f32 %v1821_v55, %v988_v56 }
 0x3af   : > { %v1822_v61 = vpop.f32.mrb[14].mxu0  ;;  %v2930_v3 = vmul.f32 %v986_v59, %v883_v58 }
 0x3b0   : > { %v2928_v63 = vmul.f32 %v1822_v61, %v989_v57  ;;  %v886_v2 = vpop.f32.mrb[15].mxu0  ;;  %v1005_v61 = vld [vmem:[%s3117_s3 + $0xd8] sm:$0xff] }
 0x3b1   : > { %v2932_v4 = vmul.f32 %v987_v60, %v886_v2 }
 0x3b2   : > { %v1047_v5 = vpack.c.bf16 %v2928_v63, %v2926_v62  ;;  %v1109_v62 = vld [vmem:[#allocation8 + $0x10] sm:$0xff]  ;;  %v1110_v63 = vld [vmem:[#allocation8 + $0x18] sm:$0xff] }
 0x3b3   : > { %v1046_v6 = vpack.c.bf16 %v2932_v4, %v2930_v3  ;;  %v1107_v3 = vld [vmem:[#allocation8] sm:$0xff]  ;;  %v1108_v4 = vld [vmem:[#allocation8 + $0x8] sm:$0xff] }
 0x3b5   : > { %v1825_v7 = vpop.f32.mrb[16].mxu0 }
 0x3b6   : > { %v899_v10 = vpop.f32.mrb[17].mxu0  ;;  %v2950_v14 = vmul.f32 %v1825_v7, %v992_v8  ;;  %v1002_v7 = vld [vmem:[%s3117_s3 + $0xc0] sm:$0xff] }
 0x3b7   : > { %v1826_v13 = vpop.f32.mrb[18].mxu0  ;;  %v2954_v17 = vmul.f32 %v990_v11, %v899_v10 }
 0x3b8   : > { %v2952_v15 = vmul.f32 %v1826_v13, %v993_v9  ;;  %v902_v16 = vpop.f32.mrb[19].mxu0 }
 0x3b9   : > { %v2956_v18 = vmul.f32 %v991_v12, %v902_v16 }
 0x3ba   : > { %v1049_v19 = vpack.c.bf16 %v2952_v15, %v2950_v14  ;;  %v1113_v14 = vld [vmem:[#allocation8 + $0x30] sm:$0xff]  ;;  %v1114_v15 = vld [vmem:[#allocation8 + $0x38] sm:$0xff] }
 0x3bb   : > { %v1048_v20 = vpack.c.bf16 %v2956_v18, %v2954_v17  ;;  %v1111_v17 = vld [vmem:[#allocation8 + $0x20] sm:$0xff]  ;;  %v1112_v18 = vld [vmem:[#allocation8 + $0x28] sm:$0xff] }
 0x3bd   : > { %v1829_v21 = vpop.f32.mrb[20].mxu0 }
 0x3be   : > { %v915_v24 = vpop.f32.mrb[21].mxu0  ;;  %v1028_v29 = vmul.f32 %v1829_v21, %v996_v22  ;;  %v1006_v21 = vld [vmem:[%s3117_s3 + $0xe0] sm:$0xff] }
 0x3bf   : > { %v1830_v28 = vpop.f32.mrb[22].mxu0  ;;  %v1026_v32 = vmul.f32 %v994_v26, %v915_v24 }
 0x3c0   : > { %v1029_v30 = vmul.f32 %v1830_v28, %v997_v23  ;;  %v918_v31 = vpop.f32.mrb[23].mxu0 }
 0x3c1   : > { %v1027_v33 = vmul.f32 %v995_v27, %v918_v31 }
 0x3c2   : > { %v1051_v36 = vpack.c.bf16 %v1029_v30, %v1028_v29  ;;  %v1997_v29 = vpack.c.bf16 %v1108_v4, %v1107_v3  ;;  %v1116_v30 = vld [vmem:[#allocation8 + $0x48] sm:$0xff]  ;;  %v1295_v3 = vld [vmem:[#allocation11] sm:$0xff] }
 0x3c3   : > { %v1050_v37 = vpack.c.bf16 %v1027_v33, %v1026_v32  ;;  %v1117_v32 = vld [vmem:[#allocation8 + $0x50] sm:$0xff]  ;;  %v1118_v33 = vld [vmem:[#allocation8 + $0x58] sm:$0xff]  ;;  %v1296_v4 = vld [vmem:[#allocation11 + $0x8] sm:$0xff] }
 0x3c5   : > { %v1833_v38 = vpop.f32.mrb[24].mxu0  ;;  %1666 = vmatprep.subr.bf16.mxu1 %v1050_v37  ;;  %v1119_v37 = vld [vmem:[#allocation8 + $0x60] sm:$0xff] }
 0x3c6   : > { %v931_v43 = vpop.f32.mrb[25].mxu0  ;;  %1667 = vmatpush3.bf16.msra.mxu1 %v1042_v40  ;;  %v1032_v47 = vmul.f32 %v1833_v38, %v1000_v41  ;;  %v1004_v40 = vld [vmem:[%s3117_s3 + $0xd0] sm:$0xff]  ;;  %v1120_v38 = vld [vmem:[#allocation8 + $0x68] sm:$0xff] }
 0x3c7   : > { %v1834_v46 = vpop.f32.mrb[26].mxu0  ;;  %1668 = vmatprep.subr.bf16.mxu1 %v1051_v36  ;;  %v1030_v56 = vmul.f32 %v998_v44, %v931_v43  ;;  %v2012_v36 = vpack.c.bf16 %v1118_v33, %v1117_v32  ;;  %v2015_v41 = vpack.c.bf16 %v1120_v38, %v1119_v37  ;;  %v1122_v43 = vld [vmem:[#allocation8 + $0x78] sm:$0xff]  ;;  %v1308_v37 = vld [vmem:[#allocation11 + $0x68] sm:$0xff] }
 0x3c8   : > { %v1033_v50 = vmul.f32 %v1834_v46, %v1001_v42  ;;  %v934_v55 = vpop.f32.mrb[27].mxu0  ;;  %v1121_v42 = vld [vmem:[#allocation8 + $0x70] sm:$0xff]  ;;  %v1202_v46 = vld [vmem:[#allocation10 + $0x8] sm:$0xff]  ;;  %v1306_v32 = vld [vmem:[#allocation11 + $0x58] sm:$0xff] }
 0x3c9   : > { %v1031_v57 = vmul.f32 %v999_v45, %v934_v55  ;;  %v2018_v44 = vpack.c.bf16 %v1122_v43, %v1121_v42  ;;  %v1201_v45 = vld [vmem:[#allocation10] sm:$0xff]  ;;  %v1204_v55 = vld [vmem:[#allocation10 + $0x18] sm:$0xff] }
 0x3ca   : > { %v1053_v58 = vpack.c.bf16 %v1033_v50, %v1032_v47  ;;  %1669 = vmatpush3.bf16.msra.mxu1 %v1043_v39  ;;  %v1203_v47 = vld [vmem:[#allocation10 + $0x10] sm:$0xff]  ;;  %v2021_v50 = vpack.c.bf16 %v1202_v46, %v1201_v45  ;;  %v1310_v42 = vld [vmem:[#allocation11 + $0x78] sm:$0xff] }
 0x3cb   : > { %v1052_v59 = vpack.c.bf16 %v1031_v57, %v1030_v56  ;;  %v2024_v56 = vpack.c.bf16 %v1204_v55, %v1203_v47  ;;  %v1205_v57 = vld [vmem:[#allocation10 + $0x20] sm:$0xff] }
 0x3cc   : > { %2022 = vmatpush3.bf16.msra.mxu0 %v2021_v50 }
 0x3cd   : > { %v1837_v60 = vpop.f32.mrb[28].mxu0  ;;  %1670 = vmatprep.subr.bf16.mxu1 %v1052_v59  ;;  %2023 = vmatprep.subr.bf16.mxu0 %v2467_v0 }
 0x3ce   : > { %v947_v2 = vpop.f32.mrb[29].mxu0  ;;  %1671 = vmatpush3.bf16.msra.mxu1 %v1044_v54  ;;  %v1036_v39 = vmul.f32 %v1837_v60, %v1004_v40  ;;  %v1207_v60 = vld [vmem:[#allocation10 + $0x30] sm:$0xff]  ;;  %v1208_v40 = vld [vmem:[#allocation10 + $0x38] sm:$0xff] }
 0x3cf   : > { %v1838_v35 = vpop.f32.mrb[30].mxu0  ;;  %1672 = vmatprep.subr.bf16.mxu1 %v1053_v58  ;;  %v1034_v10 = vmul.f32 %v1002_v7, %v947_v2  ;;  %v1206_v58 = vld [vmem:[#allocation10 + $0x28] sm:$0xff] }
 0x3d0   : > { %v1037_v8 = vmul.f32 %v1838_v35, %v1005_v61  ;;  %v950_v9 = vpop.f32.mrb[31].mxu0  ;;  %2025 = vmatpush3.bf16.msra.mxu0 %v2024_v56  ;;  %v2027_v59 = vpack.c.bf16 %v1206_v58, %v1205_v57  ;;  %v2030_v61 = vpack.c.bf16 %v1208_v40, %v1207_v60 }
 0x3d1   : > { %v1035_v11 = vmul.f32 %v1003_v34, %v950_v9  ;;  %2026 = vmatprep.subr.bf16.mxu0 %v2467_v0  ;;  %v1209_v9 = vld [vmem:[#allocation10 + $0x40] sm:$0xff] }
 0x3d2   : > { %v1055_v12 = vpack.c.bf16 %v1037_v8, %v1036_v39  ;;  %1673 = vmatpush3.bf16.msra.mxu1 %v1045_v53 }
 0x3d3   : > { %v1054_v13 = vpack.c.bf16 %v1035_v11, %v1034_v10  ;;  %v1210_v10 = vld [vmem:[#allocation10 + $0x48] sm:$0xff] }
 0x3d4   : > { %2028 = vmatpush3.bf16.msra.mxu0 %v2027_v59  ;;  %v2033_v11 = vpack.c.bf16 %v1210_v10, %v1209_v9 }
 0x3d5   : > { %v1841_v16 = vpop.f32.mrb[32].mxu0  ;;  %1674 = vmatprep.subr.bf16.mxu1 %v1054_v13  ;;  %2029 = vmatprep.subr.bf16.mxu0 %v2467_v0  ;;  %v1212_v13 = vld [vmem:[#allocation10 + $0x58] sm:$0xff] }
 0x3d6   : > { %v963_v54 = vpop.f32.mrb[33].mxu0  ;;  %1675 = vmatpush3.bf16.msra.mxu1 %v1046_v6  ;;  %v1040_v53 = vmul.f32 %v1841_v16, %v1008_v51  ;;  %v1604_v6 = vcombine.low %v2862_v25, %v2862_v25  ;;  %v2003_v25 = vpack.c.bf16 %v1112_v18, %v1111_v17  ;;  %v1213_v51 = vld [vmem:[#allocation10 + $0x60] sm:$0xff]  ;;  %v1300_v17 = vld [vmem:[#allocation11 + $0x28] sm:$0xff] }
 0x3d7   : > { %v1842_v49 = vpop.f32.mrb[34].mxu0  ;;  %1676 = vmatprep.subr.bf16.mxu1 %v1055_v12  ;;  %v1038_v24 = vmul.f32 %v1006_v21, %v963_v54  ;;  %v1211_v12 = vld [vmem:[#allocation10 + $0x50] sm:$0xff] }
 0x3d8   : > { %v1041_v22 = vmul.f32 %v1842_v49, %v1009_v52  ;;  %v966_v23 = vpop.f32.mrb[35].mxu0  ;;  %2031 = vmatpush3.bf16.msra.mxu0 %v2030_v61  ;;  %v2036_v16 = vpack.c.bf16 %v1212_v13, %v1211_v12  ;;  %v1214_v52 = vld [vmem:[#allocation10 + $0x68] sm:$0xff]  ;;  %v1215_v21 = vld [vmem:[#allocation10 + $0x70] sm:$0xff] }
 0x3d9   : > { %v1039_v26 = vmul.f32 %v1007_v48, %v966_v23  ;;  %2032 = vmatprep.subr.bf16.mxu0 %v2467_v0  ;;  %v2039_v54 = vpack.c.bf16 %v1214_v52, %v1213_v51 }
 0x3da   : > { %v1057_v27 = vpack.c.bf16 %v1041_v22, %v1040_v53  ;;  %1677 = vmatpush3.bf16.msra.mxu1 %v1047_v5  ;;  %v2000_v5 = vpack.c.bf16 %v1110_v63, %v1109_v62  ;;  %v1298_v62 = vld [vmem:[#allocation11 + $0x18] sm:$0xff] }
 0x3db   : > { %v1056_v28 = vpack.c.bf16 %v1039_v26, %v1038_v24 }
 0x3dc   : > { %2034 = vmatpush3.bf16.msra.mxu0 %v2033_v11 }
 0x3dd   : > { %1678 = vmatprep.subr.bf16.mxu1 %v1056_v28  ;;  %2035 = vmatprep.subr.bf16.mxu0 %v2467_v0 }
 0x3de   : > { %1679 = vmatpush3.bf16.msra.mxu1 %v1048_v20  ;;  %v1115_v20 = vld [vmem:[#allocation8 + $0x40] sm:$0xff] }
 0x3df   : > { %1680 = vmatprep.subr.bf16.mxu1 %v1057_v27  ;;  %v2009_v31 = vpack.c.bf16 %v1116_v30, %v1115_v20  ;;  %v1304_v20 = vld [vmem:[#allocation11 + $0x48] sm:$0xff] }
 0x3e0   : > { %2037 = vmatpush3.bf16.msra.mxu0 %v2036_v16 }
 0x3e1   : > { %2038 = vmatprep.subr.bf16.mxu0 %v2467_v0 }
 0x3e2   : > { %1681 = vmatpush3.bf16.msra.mxu1 %v1049_v19  ;;  %v2006_v19 = vpack.c.bf16 %v1114_v15, %v1113_v14  ;;  %v1302_v14 = vld [vmem:[#allocation11 + $0x38] sm:$0xff] }
 0x3e3   : > { %1996 = vmatprep.subr.bf16.mxu1 %v2467_v0 }
 0x3e4   : > { %2040 = vmatpush3.bf16.msra.mxu0 %v2039_v54 }
 0x3e5   : > { %1099 = vmatmul.mubr.bf16.vlgmr.msra.gmra.mrb[4].mxu1 %v1604_v6  ;;  %2041 = vmatprep.subr.bf16.mxu0 %v2467_v0  ;;  %v2045_v6 = vpack.c.bf16 %v1296_v4, %v1295_v3 }
 0x3e6   : > { %1998 = vmatpush3.bf16.msra.mxu1 %v1997_v29  ;;  %1875 = vmatprep.mubr.msk.f32.mxu1 %vm2468_vm0, %v2469_v1  ;;  %v1297_v29 = vld [vmem:[#allocation11 + $0x10] sm:$0xff] }
 0x3e7   : > { %1999 = vmatprep.subr.bf16.mxu1 %v2467_v0  ;;  %v2048_v63 = vpack.c.bf16 %v1298_v62, %v1297_v29 }
 0x3ea   : > { %2001 = vmatpush3.bf16.msra.mxu1 %v2000_v5  ;;  %v1299_v5 = vld [vmem:[#allocation11 + $0x20] sm:$0xff] }
 0x3eb   : > { %2002 = vmatprep.subr.bf16.mxu1 %v2467_v0  ;;  %v2051_v18 = vpack.c.bf16 %v1300_v17, %v1299_v5 }
 0x3ee   : > { %2004 = vmatpush3.bf16.msra.mxu1 %v2003_v25  ;;  %v1301_v25 = vld [vmem:[#allocation11 + $0x30] sm:$0xff] }
 0x3ef   : > { %2005 = vmatprep.subr.bf16.mxu1 %v2467_v0  ;;  %v2054_v15 = vpack.c.bf16 %v1302_v14, %v1301_v25 }
 0x3f2   : > { %2007 = vmatpush3.bf16.msra.mxu1 %v2006_v19  ;;  %v1303_v19 = vld [vmem:[#allocation11 + $0x40] sm:$0xff] }
 0x3f3   : > { %2008 = vmatprep.subr.bf16.mxu1 %v2467_v0  ;;  %v2057_v30 = vpack.c.bf16 %v1304_v20, %v1303_v19 }
 0x3f6   : > { %2010 = vmatpush3.bf16.msra.mxu1 %v2009_v31  ;;  %v1305_v31 = vld [vmem:[#allocation11 + $0x50] sm:$0xff] }
 0x3f7   : > { %2011 = vmatprep.subr.bf16.mxu1 %v2467_v0  ;;  %v2060_v33 = vpack.c.bf16 %v1306_v32, %v1305_v31 }
 0x3fa   : > { %2013 = vmatpush3.bf16.msra.mxu1 %v2012_v36  ;;  %v1307_v36 = vld [vmem:[#allocation11 + $0x60] sm:$0xff] }
 0x3fb   : > { %2014 = vmatprep.subr.bf16.mxu1 %v2467_v0  ;;  %v2063_v38 = vpack.c.bf16 %v1308_v37, %v1307_v36 }
 0x3fe   : > { %2016 = vmatpush3.bf16.msra.mxu1 %v2015_v41  ;;  %v1309_v41 = vld [vmem:[#allocation11 + $0x70] sm:$0xff] }
 0x3ff   : > { %2017 = vmatprep.subr.bf16.mxu1 %v2467_v0  ;;  %v2066_v43 = vpack.c.bf16 %v1310_v42, %v1309_v41 }
 0x402   : > { %2019 = vmatpush3.bf16.msra.mxu1 %v2018_v44 }
 0x403   : > { %2044 = vmatprep.subr.bf16.mxu1 %v2467_v0 }
 0x4b8   : > { %v1682_v2 = vpop.f32.mrb[4].mxu1 }
 0x4b9   : > { %v1683_v7 = vpop.f32.mrb[5].mxu1 }
 0x4ba   : > { %v1684_v34 = vadd.f32 %v1683_v7, %v1682_v2  ;;  %v1685_v35 = vpop.f32.mrb[6].mxu1 }
 0x4bb   : > { %v1686_v39 = vpop.f32.mrb[7].mxu1 }
 0x4bc   : > { %v1106_v8 = vmul.f32 0.01, %v1684_v34 }
 0x4be   : > { %1876 = vmatmul.mubr.f32.vlgmr.msra.gmra.mrb[2].mxu1 %v1106_v8 }
 0x4bf   : > { %1945 = vmatprep.mubr.msk.f32.mxu1 %vm2468_vm0, %v2469_v1  ;;  %v1216_v1 = vld [vmem:[#allocation10 + $0x78] sm:$0xff]  ;;  %2046 = vmatpush3.bf16.msra.mxu1 %v2045_v6 }
 0x4c0   : > { %v2042_v48 = vpack.c.bf16 %v1216_v1, %v1215_v21  ;;  %2047 = vmatprep.subr.bf16.mxu1 %v2467_v0 }
 0x4c2   : > { %2043 = vmatpush3.bf16.msra.mxu0 %v2042_v48 }
 0x4c3   : > { %2049 = vmatpush3.bf16.msra.mxu1 %v2048_v63 }
 0x4c4   : > { %2050 = vmatprep.subr.bf16.mxu1 %v2467_v0 }
 0x4c7   : > { %2052 = vmatpush3.bf16.msra.mxu1 %v2051_v18 }
 0x4c8   : > { %2053 = vmatprep.subr.bf16.mxu1 %v2467_v0 }
 0x4cb   : > { %2055 = vmatpush3.bf16.msra.mxu1 %v2054_v15 }
 0x4cc   : > { %2056 = vmatprep.subr.bf16.mxu1 %v2467_v0 }
 0x4cf   : > { %2058 = vmatpush3.bf16.msra.mxu1 %v2057_v30 }
 0x4d0   : > { %2059 = vmatprep.subr.bf16.mxu1 %v2467_v0 }
 0x4d3   : > { %2061 = vmatpush3.bf16.msra.mxu1 %v2060_v33 }
 0x4d4   : > { %2062 = vmatprep.subr.bf16.mxu1 %v2467_v0 }
 0x4d7   : > { %2064 = vmatpush3.bf16.msra.mxu1 %v2063_v38 }
 0x4d8   : > { %2065 = vmatprep.subr.bf16.mxu1 %v2467_v0 }
 0x4db   : > { %2067 = vmatpush3.bf16.msra.mxu1 %v2066_v43 }
 0x591   : > { %v1189_v49 = vpop.f32.mrb[2].mxu1 }
 0x592   : > { %v1606_v53 = vmul.f32 -1.442695, %v1189_v49  ;;  %v1877_v22 = vpop.f32.mrb[3].mxu1 }
 0x594   : > { %2197 = vpow2.f32 %v1606_v53 }
 0x59e   : > { %v2198_v23 = vpop.eup %2197 }
 0x59f   : > { %v1196_v24 = vadd.f32 1.0, %v2198_v23 }
 0x5a1   : > { %2199 = vrcp.f32 %v1196_v24 }
 0x5ab   : > { %v2200_v26 = vpop.eup %2199 }
 0x5ac   : > { %v1199_v27 = vmul.f32 %v2200_v26, %v1189_v49 }
 0x5ae   : > { %v3053_v28 = vmul.f32 1.6666666, %v1199_v27 }
 0x5b0   : > { %1911 = vmatmul.mubr.f32.vlgmr.msra.gmra.mrb[2].mxu0 %v3053_v28 }
 0x683   : > { %v1283_v44 = vpop.f32.mrb[2].mxu0 }
 0x684   : > { %v1607_v45 = vmul.f32 -1.442695, %v1283_v44  ;;  %v1912_v46 = vpop.f32.mrb[3].mxu0 }
 0x686   : > { %2201 = vpow2.f32 %v1607_v45 }
 0x690   : > { %v2202_v47 = vpop.eup %2201 }
 0x691   : > { %v1290_v50 = vadd.f32 1.0, %v2202_v47 }
 0x693   : > { %2203 = vrcp.f32 %v1290_v50 }
 0x69d   : > { %v2204_v55 = vpop.eup %2203 }
 0x69e   : > { %v1293_v56 = vmul.f32 %v2204_v55, %v1283_v44 }
 0x6a0   : > { %v1294_v57 = vmul.f32 1.6666666, %v1293_v56 }
 0x6a2   : > { %1946 = vmatmul.mubr.f32.vlgmr.msra.gmra.mrb[8].mxu1 %v1294_v57 }
 0x775   : > { %v1377_v58 = vpop.f32.mrb[8].mxu1 }
 0x776   : > { %v1608_v59 = vmul.f32 -1.442695, %v1377_v58  ;;  %v1947_v0 = vpop.f32.mrb[9].mxu1 }
 0x778   : > { %2205 = vpow2.f32 %v1608_v59 }
 0x782   : > { %v2206_v60 = vpop.eup %2205 }
 0x783   : > { %v1384_v40 = vadd.f32 1.0, %v2206_v60 }
 0x785   : > { %2207 = vrcp.f32 %v1384_v40 }
 0x78f   : > { %v2208_v61 = vpop.eup %2207 }
 0x790   : > { %v1387_v2 = vmul.f32 %v2208_v61, %v1377_v58 }
 0x792   : > { %v1388_v7 = vmul.f32 1.6666666, %v1387_v2 }
 0x794   : > { %v1389_v34 = vadd.f32 %v1388_v7, %v3053_v28 }
 0x796   : > { %v1390_v35 = vmul.f32 0.70710677, %v1389_v34 }
 0x798   : > { %1391 = vst [vmem:[%s449_s23] sm:$0xff] %v1390_v35 }
 0x799   : > { %2392 = shalt.err (!%p2389_p6)
}
 0x79a   : > { %s2393_s4 = scalar_lea.hbm %s3070_s14, 128  ;;  %s2397_s18 = scalar_lea.hbm %s3146_s20, 256 }
 0x79b   : > { %p2394_p10 = scmp.ne.s32.totalorder %s3070_s14, %s2393_s4  ;;  %p2398_p5 = scmp.lt.u32.totalorder %s3070_s14, %s3146_s20 }
 0x79c   : > { %p2399_p9 = scmp.lt.u32.totalorder %s2397_s18, %s2393_s4  ;;  %p2401_p4 = scmp.lt.u32.totalorder %s2393_s4, %s3070_s14 }
 0x79d   : > { %p2395_p11 = pnand %p2394_p10, %p3147_p12 }
 0x79e   : > { %p2400_p7 = por %p2399_p9, %p2398_p5 }
 0x79f   : > { %p2396_p8 = pneg %p2395_p11 }
 0x7a0   : > { %p2402_p1 = por %p2401_p4, %p2400_p7 }
 0x7a2   : > { %p2403_p13 = pnand %p2402_p1, %p2396_p8 }
 0x7a4   : > { %2406 = shalt.err (!%p2403_p13)
}
 0x7a5   : > { %2091 = dma.vmem_to_hbm [thread:$0]  (%p3147_p12), %s3072_s13, 128, %s3070_s14, %s1393_s9  }
 0x7a6 PF: > { %s1418_s19 = sand.u32 1, %s2445_s30   ;;  %p3148_p0 = scmp.ne.s32.totalorder %s3137_s25, 0 }
 0x7a7   : > { %p3149_p2 = scmp.ge.s32.totalorder %s2457_s12, 2  ;;  %s1419_s26 = scalar_lea.sflag [#allocation4], %s1418_s19 }
 0x7a9   : > { %p2114_p3 = pnand %p3149_p2, %p3148_p0 }
 0x7ab   : > { %2440 = dma.done.wait (!%p2114_p3), %s1419_s26, 128  }
 0x7ac   : > { %2442 = vsyncadd (!%p2114_p3), %s1419_s26, 4294967168  ;;  %p25_p6 = scmp.ge.s32.totalorder %s2694_s27, 4   ;;  %s3150_s30 = smov %s2449_s10 }
 0x7ad   : > { %s3151_s10 = smov %s2453_s11  ;;  %s3152_s11 = smov %s2706_s22 }
 0x7ae   : > { %s3153_s12 = smov %s2694_s27  ;;  %27 = sbr.rel (!%p25_p6) target bundleno = 11 (0xb), region = 127 }
 0x7b5   :  { %1424 = vsyncpa [#allocation3], 1 }
 0x7b6   :  { %1426 = vsyncpa [#allocation3 + $0x1], 1 }
 0x7b7   :  { %1427 = vsyncpa [#allocation6], 1 }
 0x7b8   :  { %1428 = vsyncpa [#allocation9], 1 }
 0x7b9   :  { %1429 = vsyncpa [#allocation12], 1 }
 0x7ba   :  { %1430 = vsyncpa [#allocation4], 1 }
 0x7bb   :  { %1432 = vsyncpa [#allocation4 + $0x1], 1 }

// kernel: tpu_custom_call.1
= control target key start
LH: loop header
LB: loop body
LE: loop exit
PB: predicated region body
PF: predicated region fallthrough
CT: control target
= control target key end

     0   :  { %s3114_s0 = inlined_call_operand.vmem [shape: f32[2,8,128], index: 0, kind: input, shape index: {}]   ;;  %s3115_s1 = inlined_call_operand.hbm [shape: bf16[2,8,256], index: 1, kind: input, shape index: {}]   ;;  %s3116_s2 = inlined_call_operand.vmem [shape: bf16[2,256,8], index: 2, kind: input, shape index: {}]   ;;  %s3117_s3 = inlined_call_operand.vmem [shape: f32[256,128], index: 3, kind: input, shape index: {}]   ;;  %s3118_s4 = inlined_call_operand.hbm [shape: f32[128,128], index: 4, kind: input, shape index: {}]   ;;  %s3119_s5 = inlined_call_operand.hbm [shape: f32[128,128], index: 5, kind: input, shape index: {}]   ;;  %s3120_s6 = inlined_call_operand.hbm [shape: f32[128,128], index: 6, kind: input, shape index: {}]   ;;  %s3121_s7 = inlined_call_operand.hbm [shape: f32[128,128], index: 7, kind: input, shape index: {}]   ;;  %s3122_s8 = inlined_call_operand.hbm [shape: f32[128,128], index: 8, kind: input, shape index: {}]   ;;  %s3123_s9 = inlined_call_operand.hbm [shape: f32[2,8,128], index: 9, kind: output, shape index: {}]  }
   0x1   :  { %3128 = sst [smem:[#allocation19_spill]] %s3118_s4 }
   0x2   :  { %3129 = sst [smem:[#allocation20_spill]] %s3123_s9 }
   0x3   :  { %14 = vsyncpa [#allocation3], 0 }
   0x4   :  { %16 = vsyncpa [#allocation3 + $0x1], 0 }
   0x5   :  { %17 = vsyncpa [#allocation6], 0 }
   0x6   :  { %18 = vsyncpa [#allocation9], 0 }
   0x7   :  { %19 = vsyncpa [#allocation12], 0 }
   0x8   :  { %20 = vsyncpa [#allocation4], 0 }
   0x9   :  { %22 = vsyncpa [#allocation4 + $0x1], 0  ;;  %s2521_s30 = smov 0   ;;  %s2523_s10 = smov 0  }
   0xa   :  { %s2525_s11 = smov 0   ;;  %s2527_s12 = smov 0  }
   0xb LB: > { %s2459_s13 = smov [#allocation5]   ;;  %s2542_s15 = sadd.s32 4294967295, %s2457_s12   ;;  %s2457_s12 = sphi %s2527_s12, %s3153_s12   ;;  %s2453_s11 = sphi %s2525_s11, %s3152_s11   ;;  %s2449_s10 = sphi %s2523_s10, %s3151_s10   ;;  %s2445_s30 = sphi %s2521_s30, %s3150_s30  }
   0xc   : > { %s278_s14 = sshll.u32 %s2459_s13, 4  ;;  %p1549_p0 = scmp.ge.s32.totalorder %s2457_s12, 1  ;;  %s2547_s14 = int_to_ptr.vmem [resolvable:$true] %s278_s14 }
   0xd   : > { %p3125_p1 = scmp.eq.s32.totalorder %s2542_s15, 0  ;;  %p263_p2 = scmp.lt.s32.totalorder %s2457_s12, 3 }
   0xe   : > { %s2460_s17 = smov [#allocation8]   ;;  %s2461_s20 = smov [#allocation7]  }
   0xf   : > { %p2549_p3 = pnand %p1549_p0, %p263_p2  ;;  %s304_s18 = sshll.u32 %s2460_s17, 4  ;;  %s2562_s18 = int_to_ptr.vmem [resolvable:$true] %s304_s18 }
  0x10   : > { %s291_s21 = sshll.u32 %s2461_s20, 4  ;;  %s3132_s4 = sld [smem:[#allocation19_spill]]  ;;  %s2564_s21 = int_to_ptr.vmem [resolvable:$true] %s291_s21 }
  0x11   : > { %s3130_s16 = scalar_select %p2549_p3, 1, 0 }
  0x12   : > { %p2093_p5 = pneg %p2549_p3 }
  0x14   : > { %p2558_p6 = pnand %p2093_p5, %p3125_p1 }
  0x16   : > { %s2209_s24 = scalar_lea.hbm %s3132_s4, 2048  ;;  %p2574_p8 = pneg %p2558_p6 }
  0x17   : > { %p2210_p7 = scmp.ne.s32.totalorder %s3132_s4, %s2209_s24  ;;  %p2216_p11 = scmp.lt.u32.totalorder %s2209_s24, %s3132_s4 }
  0x19   : > { %p2212_p9 = pnand %p2574_p8, %p2210_p7 }
  0x1b   : > { %p2213_p10 = pneg %p2212_p9 }
  0x1d   : > { %p2218_p12 = pnand %p2216_p11, %p2213_p10 }
  0x1f   : > { %2221 = shalt.err (!%p2218_p12)
}
  0x20   : > { %s2222_s13 = scalar_lea.vmem %s2547_s14, 2048  ;;  %p2230_p5 = scmp.lt.s32.totalorder %s2547_s14, %s2547_s14 }
  0x21   : > { %p2223_p13 = scmp.ne.s32.totalorder %s2547_s14, %s2222_s13  ;;  %p2231_p4 = scmp.lt.s32.totalorder %s2222_s13, %s2222_s13 }
  0x23   : > { %p2225_p0 = pnand %p2223_p13, %p2574_p8  ;;  %p2232_p7 = por %p2231_p4, %p2230_p5 }
  0x25   : > { %p2226_p2 = pneg %p2225_p0 }
  0x27   : > { %p2233_p9 = pnand %p2232_p7, %p2226_p2 }
  0x29   : > { %2236 = shalt.err (!%p2233_p9)
}
  0x2a   : > { %s2462_s17 = smov 128   ;;  %s2463_s20 = smov 8  }
  0x2b   : > { %2096 = dma.hbm_to_vmem [thread:$0]  (!%p2558_p6), %s3132_s4, 2048, %s2547_s14, [#allocation6], %s2462_s17, %s2462_s17, %s2463_s20  }
  0x2c   : > { %s2237_s26 = scalar_lea.hbm %s3120_s6, 2048 }
  0x2d   : > { %p2238_p4 = scmp.ne.s32.totalorder %s3120_s6, %s2237_s26  ;;  %p2244_p12 = scmp.lt.u32.totalorder %s2237_s26, %s3120_s6 }
  0x2f   : > { %p2240_p10 = pnand %p2238_p4, %p2574_p8 }
  0x31   : > { %p2241_p11 = pneg %p2240_p10 }
  0x33   : > { %p2246_p13 = pnand %p2244_p12, %p2241_p11 }
  0x35   : > { %2249 = shalt.err (!%p2246_p13)
}
  0x36   : > { %s2250_s14 = scalar_lea.vmem %s2562_s18, 2048  ;;  %p2258_p7 = scmp.lt.s32.totalorder %s2562_s18, %s2562_s18 }
  0x37   : > { %p2251_p0 = scmp.ne.s32.totalorder %s2562_s18, %s2250_s14  ;;  %p2259_p9 = scmp.lt.s32.totalorder %s2250_s14, %s2250_s14 }
  0x39   : > { %p2253_p2 = pnand %p2251_p0, %p2574_p8  ;;  %p2260_p4 = por %p2259_p9, %p2258_p7 }
  0x3b   : > { %p2254_p5 = pneg %p2253_p2 }
  0x3d   : > { %p2261_p10 = pnand %p2260_p4, %p2254_p5 }
  0x3f   : > { %2264 = shalt.err (!%p2261_p10)
}
  0x40   : > { %2102 = dma.hbm_to_vmem [thread:$0]  (!%p2558_p6), %s3120_s6, 2048, %s2562_s18, [#allocation9], %s2462_s17, %s2462_s17, %s2463_s20  }
  0x41   : > { %s2265_s25 = scalar_lea.hbm %s3119_s5, 2048 }
  0x42   : > { %p2266_p11 = scmp.ne.s32.totalorder %s3119_s5, %s2265_s25  ;;  %p2272_p0 = scmp.lt.u32.totalorder %s2265_s25, %s3119_s5 }
  0x44   : > { %p2268_p12 = pnand %p2266_p11, %p2574_p8 }
  0x46   : > { %p2269_p13 = pneg %p2268_p12 }
  0x48   : > { %p2274_p2 = pnand %p2272_p0, %p2269_p13 }
  0x4a   : > { %2277 = shalt.err (!%p2274_p2)
}
  0x4b   : > { %s2278_s18 = scalar_lea.vmem %s2564_s21, 2048  ;;  %p2286_p4 = scmp.lt.s32.totalorder %s2564_s21, %s2564_s21 }
  0x4c   : > { %p2279_p5 = scmp.ne.s32.totalorder %s2564_s21, %s2278_s18  ;;  %p2287_p10 = scmp.lt.s32.totalorder %s2278_s18, %s2278_s18 }
  0x4e   : > { %p2281_p7 = pnand %p2279_p5, %p2574_p8  ;;  %p2288_p11 = por %p2287_p10, %p2286_p4 }
  0x50   : > { %p2282_p9 = pneg %p2281_p7 }
  0x52   : > { %p2289_p12 = pnand %p2288_p11, %p2282_p9 }
  0x54   : > { %2292 = shalt.err (!%p2289_p12)
}
  0x55   : > { %2099 = dma.hbm_to_vmem [thread:$0]  (!%p2558_p6), %s3119_s5, 2048, %s2564_s21, [#allocation6], %s2462_s17, %s2462_s17, %s2463_s20  }
  0x56   : > { %s2464_s22 = smov [#allocation10]   ;;  %s2465_s24 = smov [#allocation11]  }
  0x57   : > { %s317_s23 = sshll.u32 %s2464_s22, 4  ;;  %s330_s25 = sshll.u32 %s2465_s24, 4  ;;  %s318_s23 = int_to_ptr.vmem [resolvable:$true] %s317_s23  ;;  %s331_s25 = int_to_ptr.vmem [resolvable:$true] %s330_s25 }
  0x58   : > { %s2293_s29 = scalar_lea.hbm %s3121_s7, 2048 }
  0x59   : > { %p2294_p13 = scmp.ne.s32.totalorder %s3121_s7, %s2293_s29  ;;  %p2300_p5 = scmp.lt.u32.totalorder %s2293_s29, %s3121_s7 }
  0x5b   : > { %p2296_p0 = pnand %p2294_p13, %p2574_p8 }
  0x5d   : > { %p2297_p2 = pneg %p2296_p0 }
  0x5f   : > { %p2302_p7 = pnand %p2300_p5, %p2297_p2 }
  0x61   : > { %2305 = shalt.err (!%p2302_p7)
}
  0x62   : > { %s2306_s21 = scalar_lea.vmem %s318_s23, 2048  ;;  %p2314_p11 = scmp.lt.s32.totalorder %s318_s23, %s318_s23 }
  0x63   : > { %p2307_p9 = scmp.ne.s32.totalorder %s318_s23, %s2306_s21  ;;  %p2315_p12 = scmp.lt.s32.totalorder %s2306_s21, %s2306_s21 }
  0x65   : > { %p2309_p4 = pnand %p2307_p9, %p2574_p8  ;;  %p2316_p1 = por %p2315_p12, %p2314_p11 }
  0x67   : > { %p2310_p10 = pneg %p2309_p4 }
  0x69   : > { %p2317_p3 = pnand %p2316_p1, %p2310_p10 }
  0x6b   : > { %2320 = shalt.err (!%p2317_p3)
}
  0x6c   : > { %2105 = dma.hbm_to_vmem [thread:$0]  (!%p2558_p6), %s3121_s7, 2048, %s318_s23, [#allocation9], %s2462_s17, %s2462_s17, %s2463_s20  }
  0x6d   : > { %s2321_s26 = scalar_lea.hbm %s3122_s8, 2048 }
  0x6e   : > { %p2322_p1 = scmp.ne.s32.totalorder %s3122_s8, %s2321_s26  ;;  %p2328_p0 = scmp.lt.u32.totalorder %s2321_s26, %s3122_s8 }
  0x70   : > { %p2324_p3 = pnand %p2322_p1, %p2574_p8 }
  0x72   : > { %p2325_p13 = pneg %p2324_p3 }
  0x74   : > { %p2330_p2 = pnand %p2328_p0, %p2325_p13 }
  0x76   : > { %2333 = shalt.err (!%p2330_p2)
}
  0x77   : > { %s2334_s14 = scalar_lea.vmem %s331_s25, 2048  ;;  %p2342_p4 = scmp.lt.s32.totalorder %s331_s25, %s331_s25 }
  0x78   : > { %p2335_p5 = scmp.ne.s32.totalorder %s331_s25, %s2334_s14  ;;  %p2343_p10 = scmp.lt.s32.totalorder %s2334_s14, %s2334_s14 }
  0x7a   : > { %p2337_p7 = pnand %p2335_p5, %p2574_p8  ;;  %p2344_p11 = por %p2343_p10, %p2342_p4 }
  0x7c   : > { %p2338_p9 = pneg %p2337_p7 }
  0x7e   : > { %p2345_p12 = pnand %p2344_p11, %p2338_p9 }
  0x80   : > { %2348 = shalt.err (!%p2345_p12)
}
  0x81   : > { %2108 = dma.hbm_to_vmem [thread:$0]  (!%p2558_p6), %s3122_s8, 2048, %s331_s25, [#allocation12], %s2462_s17, %s2462_s17, %s2463_s20  }
  0x82   : > { %s1548_s19 = sadd.s32 4294967294, %s2457_s12   ;;  %s2694_s27 = sadd.s32 1, %s2457_s12  }
  0x83   : > { %s61_s4 = sadd.s32 1, %s2453_s11  ;;  %s58_s9 = ssub.s32 %s2457_s12, %s2694_s27 }
  0x84   : > { %p68_p8 = scmp.ne.s32.totalorder %s2453_s11, %s2449_s10  ;;  %p59_p1 = scmp.eq.s32.totalorder %s58_s9, 0 }
  0x85   : > { %p69_p3 = scmp.eq.s32.totalorder %s2457_s12, 0  ;;  %p74_p13 = scmp.ne.s32.totalorder %s2449_s10, %s2445_s30 }
  0x86   : > { %p250_p0 = scmp.eq.s32.totalorder %s2542_s15, 1  ;;  %p3134_p5 = scmp.eq.s32.totalorder %s2542_s15, 0 }
  0x87   : > { %s2706_s22 = scalar_select %p59_p1, %s2453_s11, %s61_s4  }
  0x88   : > { %p70_p2 = por %p69_p3, %p68_p8  ;;  %p2710_p7 = por %p3134_p5, %p74_p13 }
  0x89   : > { %p2714_p6 = por %p250_p0, %p68_p8  ;;  %p256_p9 = scmp.eq.s32.totalorder %s1548_s19, 1 }
  0x8a   : > { %p2122_p4 = scmp.lt.s32.totalorder %s2457_s12, 2  ;;  %s351_s20 = sand.u32 1, %s2453_s11  }
  0x8b   : > { %s3136_s17 = scalar_select %p2714_p6, 1, 0 }
  0x8c   : > { %p2720_p10 = por %p256_p9, %p74_p13  ;;  %s1556_s26 = sshll.u32 %s351_s20, 3 }
  0x8d   : > { %s1613_s28 = sshll.u32 %s2457_s12, 7  ;;  %s355_s14 = scalar_lea.vmem [#allocation2], %s1556_s26 }
  0x8e   : > { %s3137_s25 = scalar_select %p2720_p10, 1, 0 }
  0x8f   : > { %s2728_s18 = scalar_lea.hbm %s3115_s1, %s1613_s28  ;;  %s363_s23 = sshll.u32 %s355_s14, 4  ;;  %s2734_s23 = int_to_ptr.vmem [resolvable:$true] %s363_s23 }
  0x90   : > { %p2730_p11 = pnand %p2122_p4, %p70_p2  ;;  %s352_s19 = scalar_lea.sflag [#allocation3], %s351_s20 }
  0x91   : > { %s2349_s4 = scalar_lea.hbm %s2728_s18, 128  ;;  %s2354_s28 = scalar_lea.hbm %s3115_s1, 256 }
  0x92   : > { %p2350_p12 = scmp.ne.s32.totalorder %s2728_s18, %s2349_s4  ;;  %p2351_p8 = pneg %p2730_p11 }
  0x93   : > { %p2355_p13 = scmp.lt.u32.totalorder %s2728_s18, %s3115_s1  ;;  %p2356_p0 = scmp.lt.u32.totalorder %s2354_s28, %s2349_s4 }
  0x94   : > { %p2352_p1 = pnand %p2351_p8, %p2350_p12  ;;  %p2358_p5 = scmp.lt.u32.totalorder %s2349_s4, %s2728_s18 }
  0x95   : > { %p2357_p2 = por %p2356_p0, %p2355_p13 }
  0x96   : > { %p2353_p3 = pneg %p2352_p1 }
  0x97   : > { %p2359_p9 = por %p2358_p5, %p2357_p2 }
  0x99   : > { %p2360_p4 = pnand %p2359_p9, %p2353_p3 }
  0x9b   : > { %2363 = shalt.err (!%p2360_p4)
}
  0x9c   : > { %s2364_s20 = scalar_lea.vmem %s2734_s23, 128  ;;  %s2466_s14 = smov [#allocation2]  }
  0x9d   : > { %p2365_p12 = scmp.ne.s32.totalorder %s2734_s23, %s2364_s20  ;;  %s2369_s9 = sshll.u32 %s2466_s14, 4  ;;  %s2370_s9 = int_to_ptr.vmem [resolvable:$false] %s2369_s9 }
  0x9e   : > { %s2371_s26 = scalar_lea.vmem %s2370_s9, 256  ;;  %p2372_p6 = scmp.lt.s32.totalorder %s2734_s23, %s2370_s9 }
  0x9f   : > { %p2367_p1 = pnand %p2365_p12, %p2351_p8  ;;  %p2373_p13 = scmp.lt.s32.totalorder %s2371_s26, %s2364_s20 }
  0xa1   : > { %p2368_p10 = pneg %p2367_p1  ;;  %p2374_p0 = por %p2373_p13, %p2372_p6 }
  0xa3   : > { %p2375_p2 = pnand %p2374_p0, %p2368_p10 }
  0xa5   : > { %2378 = shalt.err (!%p2375_p2)
}
  0xa6   : > { %2112 = dma.hbm_to_vmem [thread:$0]  (!%p2730_p11), %s2728_s18, 128, %s2734_s23, %s352_s19  }
  0xa7   : > { %p3139_p3 = scmp.ne.s32.totalorder %s3130_s16, 0 }
  0xa8   : > { %s2764_s4 = sand.u32 (!%p3139_p3), 1, %s2449_s10  }
  0xa9   : > { %380 = sbr.rel (%p3139_p3) target bundleno = 1958 (0x7a6), region = 56  ;;  %s1560_s28 = sshll.u32 (!%p3139_p3), %s2764_s4, 3 }
  0xaa   : > { %s383_s29 = scalar_lea.sflag (!%p3139_p3), [#allocation3], %s2764_s4  ;;  %s2770_s13 = scalar_lea.vmem (!%p3139_p3), [#allocation2], %s1560_s28 }
  0xb0   : > { %2424 = dma.done.wait (%p2710_p7), %s383_s29, 128  }
  0xb1   : > { %2426 = vsyncadd (%p2710_p7), %s383_s29, 4294967168  ;;  %p3140_p6 = scmp.eq.s32.totalorder %s2542_s15, 0 }
  0xb3   : > { %2428 = dma.done.wait (%p3140_p6), [#allocation6], 4096   ;;  %p3141_p10 = pmov %p3140_p6 }
  0xb4   : > { %p3142_p11 = pmov %p3140_p6 }
  0xb5   : > { %2430 = vsyncadd (%p3141_p10), [#allocation6], 4294963200 }
  0xb6   : > { %2432 = dma.done.wait (%p3142_p11), [#allocation9], 4096   ;;  %p3143_p8 = pmov %p3140_p6 }
  0xb7   : > { %p3144_p5 = pmov %p3140_p6 }
  0xb8   : > { %2434 = vsyncadd (%p3143_p8), [#allocation9], 4294963200 }
  0xb9   : > { %2436 = dma.done.wait (%p3144_p5), [#allocation12], 2048   ;;  %p3145_p9 = pmov %p3144_p5 }
  0xba   : > { %v2467_v0 = vmov 0.0|0.0   ;;  %vm2468_vm0 = vmmov 0   ;;  %v2469_v1 = vmov 0.0   ;;  %p450_p7 = scmp.lt.s32.totalorder %s2542_s15, 1  ;;  %v461_v2 = vld [vmem:[#allocation5] sm:$0xff]  ;;  %v462_v3 = vld [vmem:[#allocation5 + $0x8] sm:$0xff] }
  0xbb   : > { %2438 = vsyncadd (%p3145_p9), [#allocation12], 4294965248  ;;  %1948 = vmatprep.subr.bf16.mxu0 %v2467_v0  ;;  %1771 = vmatprep.mubr.msk.f32.mxu0 %vm2468_vm0, %v2469_v1  ;;  %v463_v4 = vld [vmem:[#allocation5 + $0x10] sm:$0xff]  ;;  %v1949_v5 = vpack.c.bf16 %v462_v3, %v461_v2  ;;  %v464_v6 = vld [vmem:[#allocation5 + $0x18] sm:$0xff]  ;;  %vm764_vm1 = vcmask 64512   ;;  %vm813_vm2 = vcmask 1043456  }
  0xbc   : > { %1972 = vmatprep.subr.bf16.mxu1 %v2467_v0  ;;  %1806 = vmatprep.mubr.msk.f32.mxu1 %vm2468_vm0, %v2469_v1  ;;  %s2796_s16 = scalar_select %p450_p7, %s2542_s15, 1  ;;  %v1952_v7 = vpack.c.bf16 %v464_v6, %v463_v4  ;;  %v465_v8 = vld [vmem:[#allocation5 + $0x20] sm:$0xff]  ;;  %v466_v9 = vld [vmem:[#allocation5 + $0x28] sm:$0xff]  ;;  %v467_v10 = vld [vmem:[#allocation5 + $0x30] sm:$0xff] }
  0xbd   : > { %1950 = vmatpush3.bf16.msra.mxu0 %v1949_v5  ;;  %v468_v11 = vld [vmem:[#allocation5 + $0x38] sm:$0xff]  ;;  %v1955_v12 = vpack.c.bf16 %v466_v9, %v465_v8  ;;  %v469_v13 = vld [vmem:[#allocation5 + $0x40] sm:$0xff]  ;;  %v470_v14 = vld [vmem:[#allocation5 + $0x48] sm:$0xff]  ;;  %s1610_s18 = sshll.u32 %s2542_s15, 7  ;;  %s449_s23 = scalar_lea.vmem [#allocation13], %s1560_s28 }
  0xbe   : > { %s1614_s24 = sshll.u32 %s2796_s16, 7  ;;  %1951 = vmatprep.subr.bf16.mxu0 %v2467_v0  ;;  %v1958_v15 = vpack.c.bf16 %v468_v11, %v467_v10  ;;  %v1961_v16 = vpack.c.bf16 %v470_v14, %v469_v13  ;;  %v471_v17 = vld [vmem:[#allocation5 + $0x50] sm:$0xff]  ;;  %v472_v18 = vld [vmem:[#allocation5 + $0x58] sm:$0xff]  ;;  %v473_v20 = vld [vmem:[#allocation5 + $0x60] sm:$0xff]  ;;  %s1567_s19 = sshll.u32 %s2796_s16, 3 }
  0xbf   : > { %s2803_s21 = scalar_lea.vmem %s3116_s2, %s1614_s24  ;;  %v1964_v19 = vpack.c.bf16 %v472_v18, %v471_v17  ;;  %v474_v21 = vld [vmem:[#allocation5 + $0x68] sm:$0xff]  ;;  %v475_v23 = vld [vmem:[#allocation5 + $0x70] sm:$0xff]  ;;  %v476_v24 = vld [vmem:[#allocation5 + $0x78] sm:$0xff]  ;;  %s453_s9 = scalar_lea.vmem %s3114_s0, %s1567_s19 }
  0xc0   : > { %v1967_v22 = vpack.c.bf16 %v474_v21, %v473_v20  ;;  %v1970_v25 = vpack.c.bf16 %v476_v24, %v475_v23  ;;  %v2815_v26 = vld [vmem:[%s453_s9] sm:$0xff]  ;;  %v555_v27 = vld [vmem:[#allocation7] sm:$0xff]  ;;  %v556_v28 = vld [vmem:[#allocation7 + $0x8] sm:$0xff]  ;;  %s3146_s20 = sld [smem:[#allocation20_spill]]  ;;  %s1393_s9 = scalar_lea.sflag [#allocation4], %s2764_s4 }
  0xc1   : > { %1953 = vmatpush3.bf16.msra.mxu0 %v1952_v7  ;;  %v1973_v29 = vpack.c.bf16 %v556_v28, %v555_v27  ;;  %v557_v30 = vld [vmem:[#allocation7 + $0x10] sm:$0xff]  ;;  %v558_v31 = vld [vmem:[#allocation7 + $0x18] sm:$0xff]  ;;  %v559_v33 = vld [vmem:[#allocation7 + $0x20] sm:$0xff]  ;;  %p3147_p12 = scmp.ne.s32.totalorder %s3136_s17, 0  ;;  %s2470_s15 = smov [#allocation13]  }
  0xc2   : > { %1954 = vmatprep.subr.bf16.mxu0 %v2467_v0  ;;  %v1976_v32 = vpack.c.bf16 %v558_v31, %v557_v30  ;;  %v560_v34 = vld [vmem:[#allocation7 + $0x28] sm:$0xff]  ;;  %v561_v36 = vld [vmem:[#allocation7 + $0x30] sm:$0xff]  ;;  %v562_v37 = vld [vmem:[#allocation7 + $0x38] sm:$0xff]  ;;  %s2383_s28 = sshll.u32 %s2470_s15, 4  ;;  %s2384_s28 = int_to_ptr.vmem [resolvable:$false] %s2383_s28 }
  0xc3   : > { %1974 = vmatpush3.bf16.msra.mxu1 %v1973_v29  ;;  %v1979_v35 = vpack.c.bf16 %v560_v34, %v559_v33  ;;  %v1982_v38 = vpack.c.bf16 %v562_v37, %v561_v36  ;;  %v563_v39 = vld [vmem:[#allocation7 + $0x40] sm:$0xff]  ;;  %v564_v40 = vld [vmem:[#allocation7 + $0x48] sm:$0xff]  ;;  %v565_v42 = vld [vmem:[#allocation7 + $0x50] sm:$0xff]  ;;  %s2385_s29 = scalar_lea.vmem %s2384_s28, 256 }
  0xc4   : > { %1975 = vmatprep.subr.bf16.mxu1 %v2467_v0  ;;  %v1985_v41 = vpack.c.bf16 %v564_v40, %v563_v39  ;;  %v566_v43 = vld [vmem:[#allocation7 + $0x58] sm:$0xff]  ;;  %v567_v45 = vld [vmem:[#allocation7 + $0x60] sm:$0xff]  ;;  %v568_v46 = vld [vmem:[#allocation7 + $0x68] sm:$0xff] }
  0xc5   : > { %1956 = vmatpush3.bf16.msra.mxu0 %v1955_v12  ;;  %v1988_v44 = vpack.c.bf16 %v566_v43, %v565_v42  ;;  %v1991_v47 = vpack.c.bf16 %v568_v46, %v567_v45  ;;  %v569_v48 = vld [vmem:[#allocation7 + $0x70] sm:$0xff]  ;;  %v570_v49 = vld [vmem:[#allocation7 + $0x78] sm:$0xff]  ;;  %v2173_v11 = vld [vmem:[%s2803_s21 + $0x10] sm:$0xff]  }
  0xc6   : > { %1957 = vmatprep.subr.bf16.mxu0 %v2467_v0  ;;  %v1994_v50 = vpack.c.bf16 %v570_v49, %v569_v48  ;;  %v2171_v59 = vld [vmem:[%s2803_s21] sm:$0xff]   ;;  %v2172_v10 = vld [vmem:[%s2803_s21 + $0x8] sm:$0xff]   ;;  %v2174_v12 = vld [vmem:[%s2803_s21 + $0x18] sm:$0xff]   ;;  %s3070_s14 = scalar_lea.hbm %s3146_s20, %s1610_s18 }
  0xc7   : > { %1977 = vmatpush3.bf16.msra.mxu1 %v1976_v32  ;;  %v2175_v13 = vld [vmem:[%s2803_s21 + $0x20] sm:$0xff]   ;;  %v2176_v14 = vld [vmem:[%s2803_s21 + $0x28] sm:$0xff]   ;;  %v2182_v20 = vld [vmem:[%s2803_s21 + $0x58] sm:$0xff]  }
  0xc8   : > { %1978 = vmatprep.subr.bf16.mxu1 %v2467_v0  ;;  %v2179_v17 = vld [vmem:[%s2803_s21 + $0x40] sm:$0xff]   ;;  %v2180_v18 = vld [vmem:[%s2803_s21 + $0x48] sm:$0xff]   ;;  %v2185_v23 = vld [vmem:[%s2803_s21 + $0x70] sm:$0xff]  }
  0xc9   : > { %1959 = vmatpush3.bf16.msra.mxu0 %v1958_v15  ;;  %v2177_v15 = vld [vmem:[%s2803_s21 + $0x30] sm:$0xff]   ;;  %v2183_v21 = vld [vmem:[%s2803_s21 + $0x60] sm:$0xff]   ;;  %v2186_v24 = vld [vmem:[%s2803_s21 + $0x78] sm:$0xff]  }
  0xca   : > { %1960 = vmatprep.subr.bf16.mxu0 %v2467_v0  ;;  %v980_v28 = vld [vmem:[%s3117_s3 + $0x10] sm:$0xff]  ;;  %v981_v29 = vld [vmem:[%s3117_s3 + $0x18] sm:$0xff]  ;;  %v978_v31 = vld [vmem:[%s3117_s3] sm:$0xff] }
  0xcb   : > { %1980 = vmatpush3.bf16.msra.mxu1 %v1979_v35  ;;  %v979_v32 = vld [vmem:[%s3117_s3 + $0x8] sm:$0xff]  ;;  %v984_v42 = vld [vmem:[%s3117_s3 + $0x30] sm:$0xff]  ;;  %v985_v43 = vld [vmem:[%s3117_s3 + $0x38] sm:$0xff] }
  0xcc   : > { %1981 = vmatprep.subr.bf16.mxu1 %v2467_v0  ;;  %v982_v45 = vld [vmem:[%s3117_s3 + $0x20] sm:$0xff]  ;;  %v983_v46 = vld [vmem:[%s3117_s3 + $0x28] sm:$0xff] }
  0xcd   : > { %1962 = vmatpush3.bf16.msra.mxu0 %v1961_v16  ;;  %v2178_v16 = vld [vmem:[%s2803_s21 + $0x38] sm:$0xff]  }
  0xce   : > { %1963 = vmatprep.subr.bf16.mxu0 %v2467_v0 }
  0xcf   : > { %1983 = vmatpush3.bf16.msra.mxu1 %v1982_v38 }
  0xd0   : > { %1984 = vmatprep.subr.bf16.mxu1 %v2467_v0 }
  0xd1   : > { %1965 = vmatpush3.bf16.msra.mxu0 %v1964_v19  ;;  %v2181_v19 = vld [vmem:[%s2803_s21 + $0x50] sm:$0xff]  }
  0xd2   : > { %1966 = vmatprep.subr.bf16.mxu0 %v2467_v0 }
  0xd3   : > { %1986 = vmatpush3.bf16.msra.mxu1 %v1985_v41 }
  0xd4   : > { %1987 = vmatprep.subr.bf16.mxu1 %v2467_v0 }
  0xd5   : > { %1968 = vmatpush3.bf16.msra.mxu0 %v1967_v22  ;;  %v2184_v22 = vld [vmem:[%s2803_s21 + $0x68] sm:$0xff]  }
  0xd6   : > { %1969 = vmatprep.subr.bf16.mxu0 %v2467_v0 }
  0xd7   : > { %1989 = vmatpush3.bf16.msra.mxu1 %v1988_v44 }
  0xd8   : > { %1990 = vmatprep.subr.bf16.mxu1 %v2467_v0 }
  0xd9   : > { %1971 = vmatpush3.bf16.msra.mxu0 %v1970_v25  ;;  %v2862_v25 = vld [vmem:[%s2770_s13] sm:$0xff]  ;;  %s1406_s13 = sshll.u32 %s449_s23, 4  ;;  %s3072_s13 = int_to_ptr.vmem [resolvable:$true] %s1406_s13 }
  0xda   : > { %s2379_s26 = scalar_lea.vmem %s3072_s13, 128  ;;  %p2386_p0 = scmp.lt.s32.totalorder %s3072_s13, %s2384_s28 }
  0xdb   : > { %1992 = vmatpush3.bf16.msra.mxu1 %v1991_v47  ;;  %p2380_p4 = scmp.ne.s32.totalorder %s3072_s13, %s2379_s26  ;;  %p2387_p2 = scmp.lt.s32.totalorder %s2385_s29, %s2379_s26 }
  0xdc   : > { %1772 = vmatmul.mubr.f32.vlgmr.msra.gmra.mrb[0].mxu0 %v2815_v26  ;;  %1993 = vmatprep.subr.bf16.mxu1 %v2467_v0 }
  0xdd   : > { %1811 = vmatprep.mubr.msk.bf16.mxu0 %vm764_vm1, %v2171_v59  ;;  %v986_v59 = vld [vmem:[%s3117_s3 + $0x40] sm:$0xff]  ;;  %p2381_p1 = pnand %p2380_p4, %p3147_p12  ;;  %p2388_p3 = por %p2387_p2, %p2386_p0 }
  0xdf   : > { %1995 = vmatpush3.bf16.msra.mxu1 %v1994_v50  ;;  %p2382_p13 = pneg %p2381_p1 }
  0xe1   : > { %p2389_p6 = pnand %p2388_p3, %p2382_p13 }
 0x1af   : > { %v543_v51 = vpop.f32.mrb[0].mxu0 }
 0x1b0   : > { %v1570_v52 = vmul.f32 -1.442695, %v543_v51  ;;  %v1773_v53 = vpop.f32.mrb[1].mxu0 }
 0x1b2   : > { %2189 = vpow2.f32 %v1570_v52 }
 0x1bc   : > { %v2190_v54 = vpop.eup %2189 }
 0x1bd   : > { %v550_v55 = vadd.f32 1.0, %v2190_v54 }
 0x1bf   : > { %2191 = vrcp.f32 %v550_v55 }
 0x1c9   : > { %v2192_v56 = vpop.eup %2191 }
 0x1ca   : > { %v553_v57 = vmul.f32 %v2192_v56, %v543_v51  ;;  %v988_v56 = vld [vmem:[%s3117_s3 + $0x50] sm:$0xff] }
 0x1cc   : > { %v554_v58 = vmul.f32 1.6666666, %v553_v57  ;;  %v989_v57 = vld [vmem:[%s3117_s3 + $0x58] sm:$0xff] }
 0x1ce   : > { %1807 = vmatmul.mubr.f32.vlgmr.msra.gmra.mrb[0].mxu1 %v554_v58 }
 0x2a1   : > { %v637_v60 = vpop.f32.mrb[0].mxu1 }
 0x2a2   : > { %v1571_v61 = vmul.f32 -1.442695, %v637_v60  ;;  %v1808_v62 = vpop.f32.mrb[1].mxu1 }
 0x2a4   : > { %2193 = vpow2.f32 %v1571_v61 }
 0x2ae   : > { %v2194_v63 = vpop.eup %2193 }
 0x2af   : > { %v644_v2 = vadd.f32 1.0, %v2194_v63 }
 0x2b1   : > { %2195 = vrcp.f32 %v644_v2 }
 0x2bb   : > { %v2196_v3 = vpop.eup %2195 }
 0x2bc   : > { %v647_v4 = vmul.f32 %v2196_v3, %v637_v60  ;;  %v987_v60 = vld [vmem:[%s3117_s3 + $0x48] sm:$0xff] }
 0x2be   : > { %v648_v5 = vmul.f32 1.6666666, %v647_v4 }
 0x2c0   : > { %v649_v6 = vadd.f32 %v648_v5, %v2815_v26  ;;  %v1605_v26 = vcombine.high %v2862_v25, %v2862_v25 }
 0x2c2   : > { %v650_v7 = vmul.f32 0.70710677, %v649_v6  ;;  %1098 = vmatprep.mubr.bf16.mxu1 %v1605_v26  ;;  %v994_v26 = vld [vmem:[%s3117_s3 + $0x80] sm:$0xff] }
 0x2c4   : > { %v651_v8 = vpack.c.bf16 %v650_v7, %v650_v7 }
 0x2c6   : > { %2068 = vmatprep.subr.msk.bf16.mxu0 %vm813_vm2, %v651_v8  ;;  %v815_v9 = vsel %vm813_vm2, %v651_v8, 0  ;;  %v992_v8 = vld [vmem:[%s3117_s3 + $0x70] sm:$0xff] }
 0x2c7   : > { %1810 = vmatpush3.bf16.msra.mxu0 %v815_v9  ;;  %v993_v9 = vld [vmem:[%s3117_s3 + $0x78] sm:$0xff] }
 0x2c8   : > { %2020 = vmatprep.subr.bf16.mxu0 %v2467_v0 }
 0x2ca   : > { %1812 = vmatmul.mubr.msk.bf16.vlgmr.msra.gmra.mrb[4].mxu0 %vm764_vm1, %v2172_v10 }
 0x2cb   : > { %1815 = vmatprep.mubr.msk.bf16.mxu0 %vm764_vm1, %v2173_v11  ;;  %v990_v11 = vld [vmem:[%s3117_s3 + $0x60] sm:$0xff] }
 0x2d2   : > { %1816 = vmatmul.mubr.msk.bf16.gmra.mrb[8].mxu0 %vm764_vm1, %v2174_v12  ;;  %v991_v12 = vld [vmem:[%s3117_s3 + $0x68] sm:$0xff] }
 0x2d3   : > { %1819 = vmatprep.mubr.msk.bf16.mxu0 %vm764_vm1, %v2175_v13 }
 0x2da   : > { %1820 = vmatmul.mubr.msk.bf16.gmra.mrb[12].mxu0 %vm764_vm1, %v2176_v14 }
 0x2db   : > { %1823 = vmatprep.mubr.msk.bf16.mxu0 %vm764_vm1, %v2177_v15 }
 0x2e2   : > { %1824 = vmatmul.mubr.msk.bf16.gmra.mrb[16].mxu0 %vm764_vm1, %v2178_v16 }
 0x2e3   : > { %1827 = vmatprep.mubr.msk.bf16.mxu0 %vm764_vm1, %v2179_v17 }
 0x2ea   : > { %1828 = vmatmul.mubr.msk.bf16.gmra.mrb[20].mxu0 %vm764_vm1, %v2180_v18 }
 0x2eb   : > { %1831 = vmatprep.mubr.msk.bf16.mxu0 %vm764_vm1, %v2181_v19 }
 0x2f2   : > { %1832 = vmatmul.mubr.msk.bf16.gmra.mrb[24].mxu0 %vm764_vm1, %v2182_v20 }
 0x2f3   : > { %1835 = vmatprep.mubr.msk.bf16.mxu0 %vm764_vm1, %v2183_v21 }
 0x2fa   : > { %1836 = vmatmul.mubr.msk.bf16.gmra.mrb[28].mxu0 %vm764_vm1, %v2184_v22  ;;  %v996_v22 = vld [vmem:[%s3117_s3 + $0x90] sm:$0xff] }
 0x2fb   : > { %1839 = vmatprep.mubr.msk.bf16.mxu0 %vm764_vm1, %v2185_v23  ;;  %v997_v23 = vld [vmem:[%s3117_s3 + $0x98] sm:$0xff] }
 0x302   : > { %1840 = vmatmul.mubr.msk.bf16.gmra.mrb[32].mxu0 %vm764_vm1, %v2186_v24 }
 0x303   : > { %1910 = vmatprep.mubr.msk.f32.mxu0 %vm2468_vm0, %v2469_v1 }
 0x39d   : > { %v1813_v27 = vpop.f32.mrb[4].mxu0 }
 0x39e   : > { %v851_v30 = vpop.f32.mrb[5].mxu0  ;;  %v2878_v34 = vmul.f32 %v1813_v27, %v980_v28  ;;  %v995_v27 = vld [vmem:[%s3117_s3 + $0x88] sm:$0xff] }
 0x39f   : > { %v1814_v33 = vpop.f32.mrb[6].mxu0  ;;  %v2882_v37 = vmul.f32 %v978_v31, %v851_v30 }
 0x3a0   : > { %v2880_v35 = vmul.f32 %v1814_v33, %v981_v29  ;;  %v854_v36 = vpop.f32.mrb[7].mxu0 }
 0x3a1   : > { %v2884_v38 = vmul.f32 %v979_v32, %v854_v36 }
 0x3a2   : > { %v1043_v39 = vpack.c.bf16 %v2880_v35, %v2878_v34  ;;  %v1003_v34 = vld [vmem:[%s3117_s3 + $0xc8] sm:$0xff] }
 0x3a3   : > { %v1042_v40 = vpack.c.bf16 %v2884_v38, %v2882_v37 }
 0x3a5   : > { %v1817_v41 = vpop.f32.mrb[8].mxu0 }
 0x3a6   : > { %v867_v44 = vpop.f32.mrb[9].mxu0  ;;  %v2902_v48 = vmul.f32 %v1817_v41, %v984_v42  ;;  %v1000_v41 = vld [vmem:[%s3117_s3 + $0xb0] sm:$0xff]  ;;  %v1001_v42 = vld [vmem:[%s3117_s3 + $0xb8] sm:$0xff] }
 0x3a7   : > { %v1818_v47 = vpop.f32.mrb[10].mxu0  ;;  %v2906_v51 = vmul.f32 %v982_v45, %v867_v44  ;;  %v998_v44 = vld [vmem:[%s3117_s3 + $0xa0] sm:$0xff]  ;;  %v999_v45 = vld [vmem:[%s3117_s3 + $0xa8] sm:$0xff] }
 0x3a8   : > { %v2904_v49 = vmul.f32 %v1818_v47, %v985_v43  ;;  %v870_v50 = vpop.f32.mrb[11].mxu0 }
 0x3a9   : > { %v2908_v52 = vmul.f32 %v983_v46, %v870_v50 }
 0x3aa   : > { %v1045_v53 = vpack.c.bf16 %v2904_v49, %v2902_v48  ;;  %v1007_v48 = vld [vmem:[%s3117_s3 + $0xe8] sm:$0xff] }
 0x3ab   : > { %v1044_v54 = vpack.c.bf16 %v2908_v52, %v2906_v51  ;;  %v1008_v51 = vld [vmem:[%s3117_s3 + $0xf0] sm:$0xff]  ;;  %v1009_v52 = vld [vmem:[%s3117_s3 + $0xf8] sm:$0xff] }
 0x3ad   : > { %v1821_v55 = vpop.f32.mrb[12].mxu0 }
 0x3ae   : > { %v883_v58 = vpop.f32.mrb[13].mxu0  ;;  %v2926_v62 = vmul.f32 %v1821_v55, %v988_v56 }
 0x3af   : > { %v1822_v61 = vpop.f32.mrb[14].mxu0  ;;  %v2930_v3 = vmul.f32 %v986_v59, %v883_v58 }
 0x3b0   : > { %v2928_v63 = vmul.f32 %v1822_v61, %v989_v57  ;;  %v886_v2 = vpop.f32.mrb[15].mxu0  ;;  %v1005_v61 = vld [vmem:[%s3117_s3 + $0xd8] sm:$0xff] }
 0x3b1   : > { %v2932_v4 = vmul.f32 %v987_v60, %v886_v2 }
 0x3b2   : > { %v1047_v5 = vpack.c.bf16 %v2928_v63, %v2926_v62  ;;  %v1109_v62 = vld [vmem:[#allocation8 + $0x10] sm:$0xff]  ;;  %v1110_v63 = vld [vmem:[#allocation8 + $0x18] sm:$0xff] }
 0x3b3   : > { %v1046_v6 = vpack.c.bf16 %v2932_v4, %v2930_v3  ;;  %v1107_v3 = vld [vmem:[#allocation8] sm:$0xff]  ;;  %v1108_v4 = vld [vmem:[#allocation8 + $0x8] sm:$0xff] }
 0x3b5   : > { %v1825_v7 = vpop.f32.mrb[16].mxu0 }
 0x3b6   : > { %v899_v10 = vpop.f32.mrb[17].mxu0  ;;  %v2950_v14 = vmul.f32 %v1825_v7, %v992_v8  ;;  %v1002_v7 = vld [vmem:[%s3117_s3 + $0xc0] sm:$0xff] }
 0x3b7   : > { %v1826_v13 = vpop.f32.mrb[18].mxu0  ;;  %v2954_v17 = vmul.f32 %v990_v11, %v899_v10 }
 0x3b8   : > { %v2952_v15 = vmul.f32 %v1826_v13, %v993_v9  ;;  %v902_v16 = vpop.f32.mrb[19].mxu0 }
 0x3b9   : > { %v2956_v18 = vmul.f32 %v991_v12, %v902_v16 }
 0x3ba   : > { %v1049_v19 = vpack.c.bf16 %v2952_v15, %v2950_v14  ;;  %v1113_v14 = vld [vmem:[#allocation8 + $0x30] sm:$0xff]  ;;  %v1114_v15 = vld [vmem:[#allocation8 + $0x38] sm:$0xff] }
 0x3bb   : > { %v1048_v20 = vpack.c.bf16 %v2956_v18, %v2954_v17  ;;  %v1111_v17 = vld [vmem:[#allocation8 + $0x20] sm:$0xff]  ;;  %v1112_v18 = vld [vmem:[#allocation8 + $0x28] sm:$0xff] }
 0x3bd   : > { %v1829_v21 = vpop.f32.mrb[20].mxu0 }
 0x3be   : > { %v915_v24 = vpop.f32.mrb[21].mxu0  ;;  %v1028_v29 = vmul.f32 %v1829_v21, %v996_v22  ;;  %v1006_v21 = vld [vmem:[%s3117_s3 + $0xe0] sm:$0xff] }
 0x3bf   : > { %v1830_v28 = vpop.f32.mrb[22].mxu0  ;;  %v1026_v32 = vmul.f32 %v994_v26, %v915_v24 }
 0x3c0   : > { %v1029_v30 = vmul.f32 %v1830_v28, %v997_v23  ;;  %v918_v31 = vpop.f32.mrb[23].mxu0 }
 0x3c1   : > { %v1027_v33 = vmul.f32 %v995_v27, %v918_v31 }
 0x3c2   : > { %v1051_v36 = vpack.c.bf16 %v1029_v30, %v1028_v29  ;;  %v1997_v29 = vpack.c.bf16 %v1108_v4, %v1107_v3  ;;  %v1116_v30 = vld [vmem:[#allocation8 + $0x48] sm:$0xff]  ;;  %v1295_v3 = vld [vmem:[#allocation11] sm:$0xff] }
 0x3c3   : > { %v1050_v37 = vpack.c.bf16 %v1027_v33, %v1026_v32  ;;  %v1117_v32 = vld [vmem:[#allocation8 + $0x50] sm:$0xff]  ;;  %v1118_v33 = vld [vmem:[#allocation8 + $0x58] sm:$0xff]  ;;  %v1296_v4 = vld [vmem:[#allocation11 + $0x8] sm:$0xff] }
 0x3c5   : > { %v1833_v38 = vpop.f32.mrb[24].mxu0  ;;  %1666 = vmatprep.subr.bf16.mxu1 %v1050_v37  ;;  %v1119_v37 = vld [vmem:[#allocation8 + $0x60] sm:$0xff] }
 0x3c6   : > { %v931_v43 = vpop.f32.mrb[25].mxu0  ;;  %1667 = vmatpush3.bf16.msra.mxu1 %v1042_v40  ;;  %v1032_v47 = vmul.f32 %v1833_v38, %v1000_v41  ;;  %v1004_v40 = vld [vmem:[%s3117_s3 + $0xd0] sm:$0xff]  ;;  %v1120_v38 = vld [vmem:[#allocation8 + $0x68] sm:$0xff] }
 0x3c7   : > { %v1834_v46 = vpop.f32.mrb[26].mxu0  ;;  %1668 = vmatprep.subr.bf16.mxu1 %v1051_v36  ;;  %v1030_v56 = vmul.f32 %v998_v44, %v931_v43  ;;  %v2012_v36 = vpack.c.bf16 %v1118_v33, %v1117_v32  ;;  %v2015_v41 = vpack.c.bf16 %v1120_v38, %v1119_v37  ;;  %v1122_v43 = vld [vmem:[#allocation8 + $0x78] sm:$0xff]  ;;  %v1308_v37 = vld [vmem:[#allocation11 + $0x68] sm:$0xff] }
 0x3c8   : > { %v1033_v50 = vmul.f32 %v1834_v46, %v1001_v42  ;;  %v934_v55 = vpop.f32.mrb[27].mxu0  ;;  %v1121_v42 = vld [vmem:[#allocation8 + $0x70] sm:$0xff]  ;;  %v1202_v46 = vld [vmem:[#allocation10 + $0x8] sm:$0xff]  ;;  %v1306_v32 = vld [vmem:[#allocation11 + $0x58] sm:$0xff] }
 0x3c9   : > { %v1031_v57 = vmul.f32 %v999_v45, %v934_v55  ;;  %v2018_v44 = vpack.c.bf16 %v1122_v43, %v1121_v42  ;;  %v1201_v45 = vld [vmem:[#allocation10] sm:$0xff]  ;;  %v1204_v55 = vld [vmem:[#allocation10 + $0x18] sm:$0xff] }
 0x3ca   : > { %v1053_v58 = vpack.c.bf16 %v1033_v50, %v1032_v47  ;;  %1669 = vmatpush3.bf16.msra.mxu1 %v1043_v39  ;;  %v1203_v47 = vld [vmem:[#allocation10 + $0x10] sm:$0xff]  ;;  %v2021_v50 = vpack.c.bf16 %v1202_v46, %v1201_v45  ;;  %v1310_v42 = vld [vmem:[#allocation11 + $0x78] sm:$0xff] }
 0x3cb   : > { %v1052_v59 = vpack.c.bf16 %v1031_v57, %v1030_v56  ;;  %v2024_v56 = vpack.c.bf16 %v1204_v55, %v1203_v47  ;;  %v1205_v57 = vld [vmem:[#allocation10 + $0x20] sm:$0xff] }
 0x3cc   : > { %2022 = vmatpush3.bf16.msra.mxu0 %v2021_v50 }
 0x3cd   : > { %v1837_v60 = vpop.f32.mrb[28].mxu0  ;;  %1670 = vmatprep.subr.bf16.mxu1 %v1052_v59  ;;  %2023 = vmatprep.subr.bf16.mxu0 %v2467_v0 }
 0x3ce   : > { %v947_v2 = vpop.f32.mrb[29].mxu0  ;;  %1671 = vmatpush3.bf16.msra.mxu1 %v1044_v54  ;;  %v1036_v39 = vmul.f32 %v1837_v60, %v1004_v40  ;;  %v1207_v60 = vld [vmem:[#allocation10 + $0x30] sm:$0xff]  ;;  %v1208_v40 = vld [vmem:[#allocation10 + $0x38] sm:$0xff] }
 0x3cf   : > { %v1838_v35 = vpop.f32.mrb[30].mxu0  ;;  %1672 = vmatprep.subr.bf16.mxu1 %v1053_v58  ;;  %v1034_v10 = vmul.f32 %v1002_v7, %v947_v2  ;;  %v1206_v58 = vld [vmem:[#allocation10 + $0x28] sm:$0xff] }
 0x3d0   : > { %v1037_v8 = vmul.f32 %v1838_v35, %v1005_v61  ;;  %v950_v9 = vpop.f32.mrb[31].mxu0  ;;  %2025 = vmatpush3.bf16.msra.mxu0 %v2024_v56  ;;  %v2027_v59 = vpack.c.bf16 %v1206_v58, %v1205_v57  ;;  %v2030_v61 = vpack.c.bf16 %v1208_v40, %v1207_v60 }
 0x3d1   : > { %v1035_v11 = vmul.f32 %v1003_v34, %v950_v9  ;;  %2026 = vmatprep.subr.bf16.mxu0 %v2467_v0  ;;  %v1209_v9 = vld [vmem:[#allocation10 + $0x40] sm:$0xff] }
 0x3d2   : > { %v1055_v12 = vpack.c.bf16 %v1037_v8, %v1036_v39  ;;  %1673 = vmatpush3.bf16.msra.mxu1 %v1045_v53 }
 0x3d3   : > { %v1054_v13 = vpack.c.bf16 %v1035_v11, %v1034_v10  ;;  %v1210_v10 = vld [vmem:[#allocation10 + $0x48] sm:$0xff] }
 0x3d4   : > { %2028 = vmatpush3.bf16.msra.mxu0 %v2027_v59  ;;  %v2033_v11 = vpack.c.bf16 %v1210_v10, %v1209_v9 }
 0x3d5   : > { %v1841_v16 = vpop.f32.mrb[32].mxu0  ;;  %1674 = vmatprep.subr.bf16.mxu1 %v1054_v13  ;;  %2029 = vmatprep.subr.bf16.mxu0 %v2467_v0  ;;  %v1212_v13 = vld [vmem:[#allocation10 + $0x58] sm:$0xff] }
 0x3d6   : > { %v963_v54 = vpop.f32.mrb[33].mxu0  ;;  %1675 = vmatpush3.bf16.msra.mxu1 %v1046_v6  ;;  %v1040_v53 = vmul.f32 %v1841_v16, %v1008_v51  ;;  %v1604_v6 = vcombine.low %v2862_v25, %v2862_v25  ;;  %v2003_v25 = vpack.c.bf16 %v1112_v18, %v1111_v17  ;;  %v1213_v51 = vld [vmem:[#allocation10 + $0x60] sm:$0xff]  ;;  %v1300_v17 = vld [vmem:[#allocation11 + $0x28] sm:$0xff] }
 0x3d7   : > { %v1842_v49 = vpop.f32.mrb[34].mxu0  ;;  %1676 = vmatprep.subr.bf16.mxu1 %v1055_v12  ;;  %v1038_v24 = vmul.f32 %v1006_v21, %v963_v54  ;;  %v1211_v12 = vld [vmem:[#allocation10 + $0x50] sm:$0xff] }
 0x3d8   : > { %v1041_v22 = vmul.f32 %v1842_v49, %v1009_v52  ;;  %v966_v23 = vpop.f32.mrb[35].mxu0  ;;  %2031 = vmatpush3.bf16.msra.mxu0 %v2030_v61  ;;  %v2036_v16 = vpack.c.bf16 %v1212_v13, %v1211_v12  ;;  %v1214_v52 = vld [vmem:[#allocation10 + $0x68] sm:$0xff]  ;;  %v1215_v21 = vld [vmem:[#allocation10 + $0x70] sm:$0xff] }
 0x3d9   : > { %v1039_v26 = vmul.f32 %v1007_v48, %v966_v23  ;;  %2032 = vmatprep.subr.bf16.mxu0 %v2467_v0  ;;  %v2039_v54 = vpack.c.bf16 %v1214_v52, %v1213_v51 }
 0x3da   : > { %v1057_v27 = vpack.c.bf16 %v1041_v22, %v1040_v53  ;;  %1677 = vmatpush3.bf16.msra.mxu1 %v1047_v5  ;;  %v2000_v5 = vpack.c.bf16 %v1110_v63, %v1109_v62  ;;  %v1298_v62 = vld [vmem:[#allocation11 + $0x18] sm:$0xff] }
 0x3db   : > { %v1056_v28 = vpack.c.bf16 %v1039_v26, %v1038_v24 }
 0x3dc   : > { %2034 = vmatpush3.bf16.msra.mxu0 %v2033_v11 }
 0x3dd   : > { %1678 = vmatprep.subr.bf16.mxu1 %v1056_v28  ;;  %2035 = vmatprep.subr.bf16.mxu0 %v2467_v0 }
 0x3de   : > { %1679 = vmatpush3.bf16.msra.mxu1 %v1048_v20  ;;  %v1115_v20 = vld [vmem:[#allocation8 + $0x40] sm:$0xff] }
 0x3df   : > { %1680 = vmatprep.subr.bf16.mxu1 %v1057_v27  ;;  %v2009_v31 = vpack.c.bf16 %v1116_v30, %v1115_v20  ;;  %v1304_v20 = vld [vmem:[#allocation11 + $0x48] sm:$0xff] }
 0x3e0   : > { %2037 = vmatpush3.bf16.msra.mxu0 %v2036_v16 }
 0x3e1   : > { %2038 = vmatprep.subr.bf16.mxu0 %v2467_v0 }
 0x3e2   : > { %1681 = vmatpush3.bf16.msra.mxu1 %v1049_v19  ;;  %v2006_v19 = vpack.c.bf16 %v1114_v15, %v1113_v14  ;;  %v1302_v14 = vld [vmem:[#allocation11 + $0x38] sm:$0xff] }
 0x3e3   : > { %1996 = vmatprep.subr.bf16.mxu1 %v2467_v0 }
 0x3e4   : > { %2040 = vmatpush3.bf16.msra.mxu0 %v2039_v54 }
 0x3e5   : > { %1099 = vmatmul.mubr.bf16.vlgmr.msra.gmra.mrb[4].mxu1 %v1604_v6  ;;  %2041 = vmatprep.subr.bf16.mxu0 %v2467_v0  ;;  %v2045_v6 = vpack.c.bf16 %v1296_v4, %v1295_v3 }
 0x3e6   : > { %1998 = vmatpush3.bf16.msra.mxu1 %v1997_v29  ;;  %1875 = vmatprep.mubr.msk.f32.mxu1 %vm2468_vm0, %v2469_v1  ;;  %v1297_v29 = vld [vmem:[#allocation11 + $0x10] sm:$0xff] }
 0x3e7   : > { %1999 = vmatprep.subr.bf16.mxu1 %v2467_v0  ;;  %v2048_v63 = vpack.c.bf16 %v1298_v62, %v1297_v29 }
 0x3ea   : > { %2001 = vmatpush3.bf16.msra.mxu1 %v2000_v5  ;;  %v1299_v5 = vld [vmem:[#allocation11 + $0x20] sm:$0xff] }
 0x3eb   : > { %2002 = vmatprep.subr.bf16.mxu1 %v2467_v0  ;;  %v2051_v18 = vpack.c.bf16 %v1300_v17, %v1299_v5 }
 0x3ee   : > { %2004 = vmatpush3.bf16.msra.mxu1 %v2003_v25  ;;  %v1301_v25 = vld [vmem:[#allocation11 + $0x30] sm:$0xff] }
 0x3ef   : > { %2005 = vmatprep.subr.bf16.mxu1 %v2467_v0  ;;  %v2054_v15 = vpack.c.bf16 %v1302_v14, %v1301_v25 }
 0x3f2   : > { %2007 = vmatpush3.bf16.msra.mxu1 %v2006_v19  ;;  %v1303_v19 = vld [vmem:[#allocation11 + $0x40] sm:$0xff] }
 0x3f3   : > { %2008 = vmatprep.subr.bf16.mxu1 %v2467_v0  ;;  %v2057_v30 = vpack.c.bf16 %v1304_v20, %v1303_v19 }
 0x3f6   : > { %2010 = vmatpush3.bf16.msra.mxu1 %v2009_v31  ;;  %v1305_v31 = vld [vmem:[#allocation11 + $0x50] sm:$0xff] }
 0x3f7   : > { %2011 = vmatprep.subr.bf16.mxu1 %v2467_v0  ;;  %v2060_v33 = vpack.c.bf16 %v1306_v32, %v1305_v31 }
 0x3fa   : > { %2013 = vmatpush3.bf16.msra.mxu1 %v2012_v36  ;;  %v1307_v36 = vld [vmem:[#allocation11 + $0x60] sm:$0xff] }
 0x3fb   : > { %2014 = vmatprep.subr.bf16.mxu1 %v2467_v0  ;;  %v2063_v38 = vpack.c.bf16 %v1308_v37, %v1307_v36 }
 0x3fe   : > { %2016 = vmatpush3.bf16.msra.mxu1 %v2015_v41  ;;  %v1309_v41 = vld [vmem:[#allocation11 + $0x70] sm:$0xff] }
 0x3ff   : > { %2017 = vmatprep.subr.bf16.mxu1 %v2467_v0  ;;  %v2066_v43 = vpack.c.bf16 %v1310_v42, %v1309_v41 }
 0x402   : > { %2019 = vmatpush3.bf16.msra.mxu1 %v2018_v44 }
 0x403   : > { %2044 = vmatprep.subr.bf16.mxu1 %v2467_v0 }
 0x4b8   : > { %v1682_v2 = vpop.f32.mrb[4].mxu1 }
 0x4b9   : > { %v1683_v7 = vpop.f32.mrb[5].mxu1 }
 0x4ba   : > { %v1684_v34 = vadd.f32 %v1683_v7, %v1682_v2  ;;  %v1685_v35 = vpop.f32.mrb[6].mxu1 }
 0x4bb   : > { %v1686_v39 = vpop.f32.mrb[7].mxu1 }
 0x4bc   : > { %v1106_v8 = vmul.f32 0.01, %v1684_v34 }
 0x4be   : > { %1876 = vmatmul.mubr.f32.vlgmr.msra.gmra.mrb[2].mxu1 %v1106_v8 }
 0x4bf   : > { %1945 = vmatprep.mubr.msk.f32.mxu1 %vm2468_vm0, %v2469_v1  ;;  %v1216_v1 = vld [vmem:[#allocation10 + $0x78] sm:$0xff]  ;;  %2046 = vmatpush3.bf16.msra.mxu1 %v2045_v6 }
 0x4c0   : > { %v2042_v48 = vpack.c.bf16 %v1216_v1, %v1215_v21  ;;  %2047 = vmatprep.subr.bf16.mxu1 %v2467_v0 }
 0x4c2   : > { %2043 = vmatpush3.bf16.msra.mxu0 %v2042_v48 }
 0x4c3   : > { %2049 = vmatpush3.bf16.msra.mxu1 %v2048_v63 }
 0x4c4   : > { %2050 = vmatprep.subr.bf16.mxu1 %v2467_v0 }
 0x4c7   : > { %2052 = vmatpush3.bf16.msra.mxu1 %v2051_v18 }
 0x4c8   : > { %2053 = vmatprep.subr.bf16.mxu1 %v2467_v0 }
 0x4cb   : > { %2055 = vmatpush3.bf16.msra.mxu1 %v2054_v15 }
 0x4cc   : > { %2056 = vmatprep.subr.bf16.mxu1 %v2467_v0 }
 0x4cf   : > { %2058 = vmatpush3.bf16.msra.mxu1 %v2057_v30 }
 0x4d0   : > { %2059 = vmatprep.subr.bf16.mxu1 %v2467_v0 }
 0x4d3   : > { %2061 = vmatpush3.bf16.msra.mxu1 %v2060_v33 }
 0x4d4   : > { %2062 = vmatprep.subr.bf16.mxu1 %v2467_v0 }
 0x4d7   : > { %2064 = vmatpush3.bf16.msra.mxu1 %v2063_v38 }
 0x4d8   : > { %2065 = vmatprep.subr.bf16.mxu1 %v2467_v0 }
 0x4db   : > { %2067 = vmatpush3.bf16.msra.mxu1 %v2066_v43 }
 0x591   : > { %v1189_v49 = vpop.f32.mrb[2].mxu1 }
 0x592   : > { %v1606_v53 = vmul.f32 -1.442695, %v1189_v49  ;;  %v1877_v22 = vpop.f32.mrb[3].mxu1 }
 0x594   : > { %2197 = vpow2.f32 %v1606_v53 }
 0x59e   : > { %v2198_v23 = vpop.eup %2197 }
 0x59f   : > { %v1196_v24 = vadd.f32 1.0, %v2198_v23 }
 0x5a1   : > { %2199 = vrcp.f32 %v1196_v24 }
 0x5ab   : > { %v2200_v26 = vpop.eup %2199 }
 0x5ac   : > { %v1199_v27 = vmul.f32 %v2200_v26, %v1189_v49 }
 0x5ae   : > { %v3053_v28 = vmul.f32 1.6666666, %v1199_v27 }
 0x5b0   : > { %1911 = vmatmul.mubr.f32.vlgmr.msra.gmra.mrb[2].mxu0 %v3053_v28 }
 0x683   : > { %v1283_v44 = vpop.f32.mrb[2].mxu0 }
 0x684   : > { %v1607_v45 = vmul.f32 -1.442695, %v1283_v44  ;;  %v1912_v46 = vpop.f32.mrb[3].mxu0 }
 0x686   : > { %2201 = vpow2.f32 %v1607_v45 }
 0x690   : > { %v2202_v47 = vpop.eup %2201 }
 0x691   : > { %v1290_v50 = vadd.f32 1.0, %v2202_v47 }
 0x693   : > { %2203 = vrcp.f32 %v1290_v50 }
 0x69d   : > { %v2204_v55 = vpop.eup %2203 }
 0x69e   : > { %v1293_v56 = vmul.f32 %v2204_v55, %v1283_v44 }
 0x6a0   : > { %v1294_v57 = vmul.f32 1.6666666, %v1293_v56 }
 0x6a2   : > { %1946 = vmatmul.mubr.f32.vlgmr.msra.gmra.mrb[8].mxu1 %v1294_v57 }
 0x775   : > { %v1377_v58 = vpop.f32.mrb[8].mxu1 }
 0x776   : > { %v1608_v59 = vmul.f32 -1.442695, %v1377_v58  ;;  %v1947_v0 = vpop.f32.mrb[9].mxu1 }
 0x778   : > { %2205 = vpow2.f32 %v1608_v59 }
 0x782   : > { %v2206_v60 = vpop.eup %2205 }
 0x783   : > { %v1384_v40 = vadd.f32 1.0, %v2206_v60 }
 0x785   : > { %2207 = vrcp.f32 %v1384_v40 }
 0x78f   : > { %v2208_v61 = vpop.eup %2207 }
 0x790   : > { %v1387_v2 = vmul.f32 %v2208_v61, %v1377_v58 }
 0x792   : > { %v1388_v7 = vmul.f32 1.6666666, %v1387_v2 }
 0x794   : > { %v1389_v34 = vadd.f32 %v1388_v7, %v3053_v28 }
 0x796   : > { %v1390_v35 = vmul.f32 0.70710677, %v1389_v34 }
 0x798   : > { %1391 = vst [vmem:[%s449_s23] sm:$0xff] %v1390_v35 }
 0x799   : > { %2392 = shalt.err (!%p2389_p6)
}
 0x79a   : > { %s2393_s4 = scalar_lea.hbm %s3070_s14, 128  ;;  %s2397_s18 = scalar_lea.hbm %s3146_s20, 256 }
 0x79b   : > { %p2394_p10 = scmp.ne.s32.totalorder %s3070_s14, %s2393_s4  ;;  %p2398_p5 = scmp.lt.u32.totalorder %s3070_s14, %s3146_s20 }
 0x79c   : > { %p2399_p9 = scmp.lt.u32.totalorder %s2397_s18, %s2393_s4  ;;  %p2401_p4 = scmp.lt.u32.totalorder %s2393_s4, %s3070_s14 }
 0x79d   : > { %p2395_p11 = pnand %p2394_p10, %p3147_p12 }
 0x79e   : > { %p2400_p7 = por %p2399_p9, %p2398_p5 }
 0x79f   : > { %p2396_p8 = pneg %p2395_p11 }
 0x7a0   : > { %p2402_p1 = por %p2401_p4, %p2400_p7 }
 0x7a2   : > { %p2403_p13 = pnand %p2402_p1, %p2396_p8 }
 0x7a4   : > { %2406 = shalt.err (!%p2403_p13)
}
 0x7a5   : > { %2091 = dma.vmem_to_hbm [thread:$0]  (%p3147_p12), %s3072_s13, 128, %s3070_s14, %s1393_s9  }
 0x7a6 PF: > { %s1418_s19 = sand.u32 1, %s2445_s30   ;;  %p3148_p0 = scmp.ne.s32.totalorder %s3137_s25, 0 }
 0x7a7   : > { %p3149_p2 = scmp.ge.s32.totalorder %s2457_s12, 2  ;;  %s1419_s26 = scalar_lea.sflag [#allocation4], %s1418_s19 }
 0x7a9   : > { %p2114_p3 = pnand %p3149_p2, %p3148_p0 }
 0x7ab   : > { %2440 = dma.done.wait (!%p2114_p3), %s1419_s26, 128  }
 0x7ac   : > { %2442 = vsyncadd (!%p2114_p3), %s1419_s26, 4294967168  ;;  %p25_p6 = scmp.ge.s32.totalorder %s2694_s27, 4   ;;  %s3150_s30 = smov %s2449_s10 }
 0x7ad   : > { %s3151_s10 = smov %s2453_s11  ;;  %s3152_s11 = smov %s2706_s22 }
 0x7ae   : > { %s3153_s12 = smov %s2694_s27  ;;  %27 = sbr.rel (!%p25_p6) target bundleno = 11 (0xb), region = 127 }
 0x7b5   :  { %1424 = vsyncpa [#allocation3], 1 }
 0x7b6   :  { %1426 = vsyncpa [#allocation3 + $0x1], 1 }
 0x7b7   :  { %1427 = vsyncpa [#allocation6], 1 }
 0x7b8   :  { %1428 = vsyncpa [#allocation9], 1 }
 0x7b9   :  { %1429 = vsyncpa [#allocation12], 1 }
 0x7ba   :  { %1430 = vsyncpa [#allocation4], 1 }
 0x7bb   :  { %1432 = vsyncpa [#allocation4 + $0x1], 1 }

</bundles_post_ra>
